<compile_context>
chip_gen: v7x
topology: tpu7x:2x2x1
jax: 0.10.0
libtpu: 0.0.40
codegen_flags: <defaults>
</compile_context>

<pallas_src>
import math
import jax
import jax.numpy as jnp
from jax.experimental import pallas as pl
from jax.experimental.pallas import tpu as pltpu

D_MODEL = 32
N_HEADS = 4
HEAD_DIM = D_MODEL // N_HEADS
D_FF = 64
NUM_LAYERS = 2
LN_EPS = 1e-5

# TODO(synk): src_mask / src_key_padding_mask have no clean static Pallas path
# here; the forward is implemented for mask=None, src_key_padding_mask=None
# (dropout is eval-mode identity).


def _layer_norm(x, g, b):
    mu = jnp.mean(x, axis=-1, keepdims=True)
    var = jnp.mean((x - mu) ** 2, axis=-1, keepdims=True)
    return (x - mu) * jax.lax.rsqrt(var + LN_EPS) * g + b


def _fused_encoder_kernel(x_ref, pos_ref,
                          wqk_ref, bqk_ref, wv_ref, bv_ref, wo_ref, bo_ref,
                          g1_ref, be1_ref, w1_ref, bb1_ref, w2_ref, bb2_ref,
                          g2_ref, be2_ref,
                          *rest):
    """All encoder layers (+ optional final LayerNorm) for one batch element."""
    if len(rest) == 3:
        gf_ref, bf_ref, out_ref = rest
    else:
        gf_ref = bf_ref = None
        (out_ref,) = rest

    _, S, D = x_ref.shape
    L, H, _, hd = wv_ref.shape
    scale = 1.0 / math.sqrt(hd)

    x = x_ref[...].reshape(S, D).astype(jnp.float32)
    p = pos_ref[...].reshape(S, D).astype(jnp.float32)

    for l in range(L):                                    # static unroll over layers
        # ---- self-attention: q = k = x + pos, v = x ----
        qk_in = jnp.broadcast_to(x + p, (H, S, D))
        x_b = jnp.broadcast_to(x, (H, S, D))

        # fused Q/K projection, batched over the leading head axis
        qk = jnp.einsum('hsd,hde->hse', qk_in, wqk_ref[l],
                        preferred_element_type=jnp.float32) + bqk_ref[l]
        q = qk[:, :, :hd] * scale
        k = qk[:, :, hd:]
        v = jnp.einsum('hsd,hde->hse', x_b, wv_ref[l],
                       preferred_element_type=jnp.float32) + bv_ref[l]

        sc = jnp.einsum('hqd,hkd->hqk', q, k, preferred_element_type=jnp.float32)
        sc = sc - jnp.max(sc, axis=-1, keepdims=True)
        e = jnp.exp(sc)
        a = e / jnp.sum(e, axis=-1, keepdims=True)
        ctx = jnp.einsum('hqk,hkd->hqd', a, v, preferred_element_type=jnp.float32)

        # output projection: sum_h ctx_h @ Wo_h  (== concat(ctx_h) @ Wo)
        attn = jnp.sum(
            jnp.einsum('hqd,hde->hqe', ctx, wo_ref[l],
                       preferred_element_type=jnp.float32), axis=0) + bo_ref[l]

        # ---- residual + LayerNorm1 ----
        x1 = _layer_norm(x + attn, g1_ref[l], be1_ref[l])

        # ---- FFN (linear -> ReLU -> linear) + residual + LayerNorm2 ----
        h1 = jnp.maximum(
            jnp.dot(x1, w1_ref[l], preferred_element_type=jnp.float32) + bb1_ref[l],
            0.0)
        ff = jnp.dot(h1, w2_ref[l], preferred_element_type=jnp.float32) + bb2_ref[l]
        x = _layer_norm(x1 + ff, g2_ref[l], be2_ref[l])

    if gf_ref is not None:
        x = _layer_norm(x, gf_ref[...], bf_ref[...])

    out_ref[...] = x.reshape(1, S, D).astype(out_ref.dtype)


# --------------------------- wrapper / weight prep ---------------------------

def _stack(layer_params, name):
    return jnp.stack([p[name] for p in layer_params])


def _prepare_kernel_weights(layer_params):
    """Stack per-layer weights and pre-split projections per head (in XLA, once)."""
    L = len(layer_params)
    D, H, hd, F = D_MODEL, N_HEADS, HEAD_DIM, D_FF

    wq, wk, wv, wo = (_stack(layer_params, n) for n in ('wq', 'wk', 'wv', 'wo'))
    bq, bk, bv, bo = (_stack(layer_params, n) for n in ('bq', 'bk', 'bv', 'bo'))

    # output columns of the projection are head-major: W[:, h*hd:(h+1)*hd]
    to_heads_w = lambda w: w.reshape(L, D, H, hd).transpose(0, 2, 1, 3)   # (L,H,D,hd)
    to_heads_b = lambda b: b.reshape(L, H, 1, hd)                          # (L,H,1,hd)

    return dict(
        wqk=jnp.concatenate([to_heads_w(wq), to_heads_w(wk)], axis=-1),    # (L,H,D,2hd)
        bqk=jnp.concatenate([to_heads_b(bq), to_heads_b(bk)], axis=-1),    # (L,H,1,2hd)
        wv=to_heads_w(wv), bv=to_heads_b(bv),
        wo=wo.reshape(L, H, hd, D),                                        # rows grouped by head
        bo=bo.reshape(L, 1, D),
        g1=_stack(layer_params, 'g1').reshape(L, 1, D),
        be1=_stack(layer_params, 'be1').reshape(L, 1, D),
        w1=_stack(layer_params, 'w1'),
        bb1=_stack(layer_params, 'bb1').reshape(L, 1, F),
        w2=_stack(layer_params, 'w2'),
        bb2=_stack(layer_params, 'bb2').reshape(L, 1, D),
        g2=_stack(layer_params, 'g2').reshape(L, 1, D),
        be2=_stack(layer_params, 'be2').reshape(L, 1, D),
    )


def transformer_encoder(src_snd, pos_snd, layer_params, norm_params=None):
    """Matches TransformerEncoder.forward(src, mask=None, src_key_padding_mask=None, pos=pos).

    src_snd / pos_snd: (S, N, D) as in the PyTorch module.
    """
    x_nsd = jnp.transpose(src_snd, (1, 0, 2))       # (N, S, D), done once
    pos_nsd = jnp.transpose(pos_snd, (1, 0, 2))
    N, S, D = x_nsd.shape

    kw = _prepare_kernel_weights(layer_params)
    weight_args = [kw['wqk'], kw['bqk'], kw['wv'], kw['bv'], kw['wo'], kw['bo'],
                   kw['g1'], kw['be1'], kw['w1'], kw['bb1'], kw['w2'], kw['bb2'],
                   kw['g2'], kw['be2']]
    if norm_params is not None:
        weight_args += [norm_params['g'].reshape(1, D),
                        norm_params['b'].reshape(1, D)]

    data_spec = pl.BlockSpec((1, S, D), lambda n: (n, 0, 0))

    def const_spec(a):
        nd = a.ndim
        return pl.BlockSpec(a.shape, lambda n, _nd=nd: (0,) * _nd)

    out_nsd = pl.pallas_call(
        _fused_encoder_kernel,
        out_shape=jax.ShapeDtypeStruct((N, S, D), src_snd.dtype),
        grid=(N,),
        in_specs=[data_spec, data_spec] + [const_spec(a) for a in weight_args],
        out_specs=data_spec,
        compiler_params=pltpu.CompilerParams(
            dimension_semantics=("parallel",)),
    )(x_nsd, pos_nsd, *weight_args)

    return jnp.transpose(out_nsd, (1, 0, 2))        # back to (S, N, D)


# ----------------------- deterministic parameter init -----------------------

def init_layer_params(key):
    ks = jax.random.split(key, 12)
    w = lambda k, s: 0.02 * jax.random.normal(k, s, jnp.float32)
    return dict(
        wq=w(ks[0], (D_MODEL, D_MODEL)), bq=w(ks[1], (D_MODEL,)),
        wk=w(ks[2], (D_MODEL, D_MODEL)), bk=w(ks[3], (D_MODEL,)),
        wv=w(ks[4], (D_MODEL, D_MODEL)), bv=w(ks[5], (D_MODEL,)),
        wo=w(ks[6], (D_MODEL, D_MODEL)), bo=w(ks[7], (D_MODEL,)),
        g1=jnp.ones((D_MODEL,), jnp.float32), be1=jnp.zeros((D_MODEL,), jnp.float32),
        w1=w(ks[8], (D_MODEL, D_FF)),  bb1=w(ks[9], (D_FF,)),
        w2=w(ks[10], (D_FF, D_MODEL)), bb2=w(ks[11], (D_MODEL,)),
        g2=jnp.ones((D_MODEL,), jnp.float32), be2=jnp.zeros((D_MODEL,), jnp.float32),
    )


# ----------------------------- pure-JAX reference ----------------------------

def _ln_ref(x, g, b):
    mu = jnp.mean(x, axis=-1, keepdims=True)
    var = jnp.mean((x - mu) ** 2, axis=-1, keepdims=True)
    return (x - mu) * jax.lax.rsqrt(var + LN_EPS) * g + b


def reference_forward(src_snd, pos_snd, layer_params, norm_params=None):
    x = jnp.transpose(src_snd, (1, 0, 2))
    p = jnp.transpose(pos_snd, (1, 0, 2))
    N, S, D = x.shape
    for prm in layer_params:
        qk = x + p
        q = qk @ prm["wq"] + prm["bq"]
        k = qk @ prm["wk"] + prm["bk"]
        v = x @ prm["wv"] + prm["bv"]
        q = q.reshape(N, S, N_HEADS, HEAD_DIM).transpose(0, 2, 1, 3)
        k = k.reshape(N, S, N_HEADS, HEAD_DIM).transpose(0, 2, 1, 3)
        v = v.reshape(N, S, N_HEADS, HEAD_DIM).transpose(0, 2, 1, 3)
        sc = jnp.einsum('nhqd,nhkd->nhqk', q, k) / math.sqrt(HEAD_DIM)
        a = jax.nn.softmax(sc, axis=-1)
        ctx = jnp.einsum('nhqk,nhkd->nhqd', a, v).transpose(0, 2, 1, 3).reshape(N, S, D)
        x1 = x + (ctx @ prm["wo"] + prm["bo"])
        x1n = _ln_ref(x1, prm["g1"], prm["be1"])
        ff = jnp.maximum(x1n @ prm["w1"] + prm["bb1"], 0.0) @ prm["w2"] + prm["bb2"]
        x = _ln_ref(x1n + ff, prm["g2"], prm["be2"])
    if norm_params is not None:
        x = _ln_ref(x, norm_params["g"], norm_params["b"])
    return jnp.transpose(x, (1, 0, 2))


if __name__ == "__main__":
    key = jax.random.PRNGKey(0)
    k_src, k_pos, *k_layers = jax.random.split(key, 2 + NUM_LAYERS)

    S, N = 8, 2
    src = jax.random.normal(k_src, (S, N, D_MODEL), jnp.float32)
    pos = jax.random.normal(k_pos, (S, N, D_MODEL), jnp.float32)

    layer_params = [init_layer_params(k) for k in k_layers]
    norm_params = dict(g=jnp.ones((D_MODEL,), jnp.float32),
                       b=jnp.zeros((D_MODEL,), jnp.float32))

    out = transformer_encoder(src, pos, layer_params, norm_params)
    out = jax.block_until_ready(out)

    ref = reference_forward(src, pos, layer_params, norm_params)
    assert out.shape == (S, N, D_MODEL)
    err = float(jnp.max(jnp.abs(out - ref)))
    assert jnp.allclose(out, ref, atol=1e-3, rtol=1e-3), err

    print("KERNEL_OK")
</pallas_src>

<mosaic_0001>
module attributes {stable_mosaic.version = 11 : i64} {
  func.func @_fused_encoder_kernel(%arg0: i32, %arg1: memref<1x8x32xf32, #tpu.memory_space<vmem>>, %arg2: memref<1x8x32xf32, #tpu.memory_space<vmem>>, %arg3: memref<2x4x32x16xf32, #tpu.memory_space<vmem>>, %arg4: memref<2x4x1x16xf32, #tpu.memory_space<vmem>>, %arg5: memref<2x4x32x8xf32, #tpu.memory_space<vmem>>, %arg6: memref<2x4x1x8xf32, #tpu.memory_space<vmem>>, %arg7: memref<2x4x8x32xf32, #tpu.memory_space<vmem>>, %arg8: memref<2x1x32xf32, #tpu.memory_space<vmem>>, %arg9: memref<2x1x32xf32, #tpu.memory_space<vmem>>, %arg10: memref<2x1x32xf32, #tpu.memory_space<vmem>>, %arg11: memref<2x32x64xf32, #tpu.memory_space<vmem>>, %arg12: memref<2x1x64xf32, #tpu.memory_space<vmem>>, %arg13: memref<2x64x32xf32, #tpu.memory_space<vmem>>, %arg14: memref<2x1x32xf32, #tpu.memory_space<vmem>>, %arg15: memref<2x1x32xf32, #tpu.memory_space<vmem>>, %arg16: memref<2x1x32xf32, #tpu.memory_space<vmem>>, %arg17: memref<1x32xf32, #tpu.memory_space<vmem>>, %arg18: memref<1x32xf32, #tpu.memory_space<vmem>>, %arg19: memref<1x8x32xf32, #tpu.memory_space<vmem>>) attributes {dimension_semantics = [#tpu.dimension_semantics<parallel>], iteration_bounds = array<i64: 2>, scalar_prefetch = 0 : i64, scratch_operands = 0 : i64, tpu.core_type = #tpu.core_type<tc>, window_params = [{transform_indices = @transform_0, window_bounds = array<i64: 1, 8, 32>}, {transform_indices = @transform_1, window_bounds = array<i64: 1, 8, 32>}, {pipeline_mode = #tpu.pipeline_mode<synchronous>, transform_indices = @transform_2, window_bounds = array<i64: 2, 4, 32, 16>}, {pipeline_mode = #tpu.pipeline_mode<synchronous>, transform_indices = @transform_3, window_bounds = array<i64: 2, 4, 1, 16>}, {pipeline_mode = #tpu.pipeline_mode<synchronous>, transform_indices = @transform_4, window_bounds = array<i64: 2, 4, 32, 8>}, {pipeline_mode = #tpu.pipeline_mode<synchronous>, transform_indices = @transform_5, window_bounds = array<i64: 2, 4, 1, 8>}, {pipeline_mode = #tpu.pipeline_mode<synchronous>, transform_indices = @transform_6, window_bounds = array<i64: 2, 4, 8, 32>}, {pipeline_mode = #tpu.pipeline_mode<synchronous>, transform_indices = @transform_7, window_bounds = array<i64: 2, 1, 32>}, {pipeline_mode = #tpu.pipeline_mode<synchronous>, transform_indices = @transform_8, window_bounds = array<i64: 2, 1, 32>}, {pipeline_mode = #tpu.pipeline_mode<synchronous>, transform_indices = @transform_9, window_bounds = array<i64: 2, 1, 32>}, {pipeline_mode = #tpu.pipeline_mode<synchronous>, transform_indices = @transform_10, window_bounds = array<i64: 2, 32, 64>}, {pipeline_mode = #tpu.pipeline_mode<synchronous>, transform_indices = @transform_11, window_bounds = array<i64: 2, 1, 64>}, {pipeline_mode = #tpu.pipeline_mode<synchronous>, transform_indices = @transform_12, window_bounds = array<i64: 2, 64, 32>}, {pipeline_mode = #tpu.pipeline_mode<synchronous>, transform_indices = @transform_13, window_bounds = array<i64: 2, 1, 32>}, {pipeline_mode = #tpu.pipeline_mode<synchronous>, transform_indices = @transform_14, window_bounds = array<i64: 2, 1, 32>}, {pipeline_mode = #tpu.pipeline_mode<synchronous>, transform_indices = @transform_15, window_bounds = array<i64: 2, 1, 32>}, {pipeline_mode = #tpu.pipeline_mode<synchronous>, transform_indices = @transform_16, window_bounds = array<i64: 1, 32>}, {pipeline_mode = #tpu.pipeline_mode<synchronous>, transform_indices = @transform_17, window_bounds = array<i64: 1, 32>}, {transform_indices = @transform_18, window_bounds = array<i64: 1, 8, 32>}]} {
    %c0 = arith.constant 0 : index
    %c0_0 = arith.constant 0 : index
    %c0_1 = arith.constant 0 : index
    %0 = vector.load %arg1[%c0, %c0_0, %c0_1] : memref<1x8x32xf32, #tpu.memory_space<vmem>>, vector<1x8x32xf32>
    %1 = vector.shape_cast %0 : vector<1x8x32xf32> to vector<8x32xf32>
    %c0_2 = arith.constant 0 : index
    %c0_3 = arith.constant 0 : index
    %c0_4 = arith.constant 0 : index
    %2 = vector.load %arg2[%c0_2, %c0_3, %c0_4] : memref<1x8x32xf32, #tpu.memory_space<vmem>>, vector<1x8x32xf32>
    %3 = vector.shape_cast %2 : vector<1x8x32xf32> to vector<8x32xf32>
    %4 = arith.addf %1, %3 : vector<8x32xf32>
    %5 = vector.shape_cast %4 : vector<8x32xf32> to vector<1x8x32xf32>
    %6 = vector.broadcast %5 : vector<1x8x32xf32> to vector<4x8x32xf32>
    %7 = vector.shape_cast %1 : vector<8x32xf32> to vector<1x8x32xf32>
    %8 = vector.broadcast %7 : vector<1x8x32xf32> to vector<4x8x32xf32>
    %c0_5 = arith.constant 0 : index
    %c0_6 = arith.constant 0 : index
    %c0_7 = arith.constant 0 : index
    %c0_8 = arith.constant 0 : index
    %9 = vector.load %arg3[%c0_5, %c0_6, %c0_7, %c0_8] : memref<2x4x32x16xf32, #tpu.memory_space<vmem>>, vector<1x4x32x16xf32>
    %10 = vector.shape_cast %9 : vector<1x4x32x16xf32> to vector<4x32x16xf32>
    "tpu.trace_start"() <{level = 10 : i32, message = "hsd,hde->hse"}> : () -> ()
    %cst = arith.constant dense<0.000000e+00> : vector<4x8x16xf32>
    %11 = tpu.matmul %6, %10, %cst {dimension_numbers = #tpu.dot_dimension_numbers<[2], [1], [1], [2], [0, 0, 0, 1, 1, 2], [0], [0]>} : vector<4x8x32xf32>, vector<4x32x16xf32>, vector<4x8x16xf32> -> vector<4x8x16xf32>
    "tpu.trace_stop"() : () -> ()
    %c0_9 = arith.constant 0 : index
    %c0_10 = arith.constant 0 : index
    %c0_11 = arith.constant 0 : index
    %c0_12 = arith.constant 0 : index
    %12 = vector.load %arg4[%c0_9, %c0_10, %c0_11, %c0_12] : memref<2x4x1x16xf32, #tpu.memory_space<vmem>>, vector<1x4x1x16xf32>
    %13 = vector.shape_cast %12 : vector<1x4x1x16xf32> to vector<4x1x16xf32>
    %14 = vector.broadcast %13 : vector<4x1x16xf32> to vector<4x8x16xf32>
    %15 = arith.addf %11, %14 : vector<4x8x16xf32>
    %16 = vector.extract_strided_slice %15 {offsets = [0, 0, 0], sizes = [4, 8, 8], strides = [1, 1, 1]} : vector<4x8x16xf32> to vector<4x8x8xf32>
    %cst_13 = arith.constant 0.353553385 : f32
    %17 = vector.broadcast %cst_13 : f32 to vector<4x8x8xf32>
    %18 = arith.mulf %16, %17 : vector<4x8x8xf32>
    %19 = vector.extract_strided_slice %15 {offsets = [0, 0, 8], sizes = [4, 8, 8], strides = [1, 1, 1]} : vector<4x8x16xf32> to vector<4x8x8xf32>
    %c0_14 = arith.constant 0 : index
    %c0_15 = arith.constant 0 : index
    %c0_16 = arith.constant 0 : index
    %c0_17 = arith.constant 0 : index
    %20 = vector.load %arg5[%c0_14, %c0_15, %c0_16, %c0_17] : memref<2x4x32x8xf32, #tpu.memory_space<vmem>>, vector<1x4x32x8xf32>
    %21 = vector.shape_cast %20 : vector<1x4x32x8xf32> to vector<4x32x8xf32>
    "tpu.trace_start"() <{level = 10 : i32, message = "hsd,hde->hse"}> : () -> ()
    %cst_18 = arith.constant dense<0.000000e+00> : vector<4x8x8xf32>
    %22 = tpu.matmul %8, %21, %cst_18 {dimension_numbers = #tpu.dot_dimension_numbers<[2], [1], [1], [2], [0, 0, 0, 1, 1, 2], [0], [0]>} : vector<4x8x32xf32>, vector<4x32x8xf32>, vector<4x8x8xf32> -> vector<4x8x8xf32>
    "tpu.trace_stop"() : () -> ()
    %c0_19 = arith.constant 0 : index
    %c0_20 = arith.constant 0 : index
    %c0_21 = arith.constant 0 : index
    %c0_22 = arith.constant 0 : index
    %23 = vector.load %arg6[%c0_19, %c0_20, %c0_21, %c0_22] : memref<2x4x1x8xf32, #tpu.memory_space<vmem>>, vector<1x4x1x8xf32>
    %24 = vector.shape_cast %23 : vector<1x4x1x8xf32> to vector<4x1x8xf32>
    %25 = vector.broadcast %24 : vector<4x1x8xf32> to vector<4x8x8xf32>
    %26 = arith.addf %22, %25 : vector<4x8x8xf32>
    "tpu.trace_start"() <{level = 10 : i32, message = "hqd,hkd->hqk"}> : () -> ()
    %cst_23 = arith.constant dense<0.000000e+00> : vector<4x8x8xf32>
    %27 = tpu.matmul %18, %19, %cst_23 {dimension_numbers = #tpu.dot_dimension_numbers<[2], [2], [1], [1], [0, 0, 0, 1, 1, 1], [0], [0]>} : vector<4x8x8xf32>, vector<4x8x8xf32>, vector<4x8x8xf32> -> vector<4x8x8xf32>
    "tpu.trace_stop"() : () -> ()
    %cst_24 = arith.constant dense<0xFF800000> : vector<4x8xf32>
    %28 = vector.multi_reduction <maximumf>, %27, %cst_24 [2] : vector<4x8x8xf32> to vector<4x8xf32>
    %29 = vector.shape_cast %28 : vector<4x8xf32> to vector<4x8x1xf32>
    %30 = vector.broadcast %29 : vector<4x8x1xf32> to vector<4x8x8xf32>
    %31 = arith.subf %27, %30 : vector<4x8x8xf32>
    %32 = math.exp %31 : vector<4x8x8xf32>
    %cst_25 = arith.constant dense<0.000000e+00> : vector<4x8xf32>
    %33 = vector.multi_reduction <add>, %32, %cst_25 [2] : vector<4x8x8xf32> to vector<4x8xf32>
    %34 = vector.shape_cast %33 : vector<4x8xf32> to vector<4x8x1xf32>
    %35 = vector.broadcast %34 : vector<4x8x1xf32> to vector<4x8x8xf32>
    %36 = arith.divf %32, %35 : vector<4x8x8xf32>
    "tpu.trace_start"() <{level = 10 : i32, message = "hqk,hkd->hqd"}> : () -> ()
    %cst_26 = arith.constant dense<0.000000e+00> : vector<4x8x8xf32>
    %37 = tpu.matmul %36, %26, %cst_26 {dimension_numbers = #tpu.dot_dimension_numbers<[2], [1], [1], [2], [0, 0, 0, 1, 1, 2], [0], [0]>} : vector<4x8x8xf32>, vector<4x8x8xf32>, vector<4x8x8xf32> -> vector<4x8x8xf32>
    "tpu.trace_stop"() : () -> ()
    %c0_27 = arith.constant 0 : index
    %c0_28 = arith.constant 0 : index
    %c0_29 = arith.constant 0 : index
    %c0_30 = arith.constant 0 : index
    %38 = vector.load %arg7[%c0_27, %c0_28, %c0_29, %c0_30] : memref<2x4x8x32xf32, #tpu.memory_space<vmem>>, vector<1x4x8x32xf32>
    %39 = vector.shape_cast %38 : vector<1x4x8x32xf32> to vector<4x8x32xf32>
    "tpu.trace_start"() <{level = 10 : i32, message = "hqd,hde->hqe"}> : () -> ()
    %cst_31 = arith.constant dense<0.000000e+00> : vector<4x8x32xf32>
    %40 = tpu.matmul %37, %39, %cst_31 {dimension_numbers = #tpu.dot_dimension_numbers<[2], [1], [1], [2], [0, 0, 0, 1, 1, 2], [0], [0]>} : vector<4x8x8xf32>, vector<4x8x32xf32>, vector<4x8x32xf32> -> vector<4x8x32xf32>
    "tpu.trace_stop"() : () -> ()
    %cst_32 = arith.constant dense<0.000000e+00> : vector<8x32xf32>
    %41 = vector.multi_reduction <add>, %40, %cst_32 [0] : vector<4x8x32xf32> to vector<8x32xf32>
    %c0_33 = arith.constant 0 : index
    %c0_34 = arith.constant 0 : index
    %c0_35 = arith.constant 0 : index
    %42 = vector.load %arg8[%c0_33, %c0_34, %c0_35] : memref<2x1x32xf32, #tpu.memory_space<vmem>>, vector<1x1x32xf32>
    %43 = vector.shape_cast %42 : vector<1x1x32xf32> to vector<1x32xf32>
    %44 = vector.broadcast %43 : vector<1x32xf32> to vector<8x32xf32>
    %45 = arith.addf %41, %44 : vector<8x32xf32>
    %46 = arith.addf %1, %45 : vector<8x32xf32>
    %c0_36 = arith.constant 0 : index
    %c0_37 = arith.constant 0 : index
    %c0_38 = arith.constant 0 : index
    %47 = vector.load %arg9[%c0_36, %c0_37, %c0_38] : memref<2x1x32xf32, #tpu.memory_space<vmem>>, vector<1x1x32xf32>
    %48 = vector.shape_cast %47 : vector<1x1x32xf32> to vector<1x32xf32>
    %c0_39 = arith.constant 0 : index
    %c0_40 = arith.constant 0 : index
    %c0_41 = arith.constant 0 : index
    %49 = vector.load %arg10[%c0_39, %c0_40, %c0_41] : memref<2x1x32xf32, #tpu.memory_space<vmem>>, vector<1x1x32xf32>
    %50 = vector.shape_cast %49 : vector<1x1x32xf32> to vector<1x32xf32>
    %cst_42 = arith.constant dense<0.000000e+00> : vector<8xf32>
    %51 = vector.multi_reduction <add>, %46, %cst_42 [1] : vector<8x32xf32> to vector<8xf32>
    %52 = vector.shape_cast %51 : vector<8xf32> to vector<8x1xf32>
    %cst_43 = arith.constant 3.200000e+01 : f32
    %53 = vector.broadcast %cst_43 : f32 to vector<8x1xf32>
    %54 = arith.divf %52, %53 : vector<8x1xf32>
    %55 = vector.broadcast %54 : vector<8x1xf32> to vector<8x32xf32>
    %56 = arith.subf %46, %55 : vector<8x32xf32>
    %57 = arith.mulf %56, %56 : vector<8x32xf32>
    %cst_44 = arith.constant dense<0.000000e+00> : vector<8xf32>
    %58 = vector.multi_reduction <add>, %57, %cst_44 [1] : vector<8x32xf32> to vector<8xf32>
    %59 = vector.shape_cast %58 : vector<8xf32> to vector<8x1xf32>
    %cst_45 = arith.constant 3.200000e+01 : f32
    %60 = vector.broadcast %cst_45 : f32 to vector<8x1xf32>
    %61 = arith.divf %59, %60 : vector<8x1xf32>
    %62 = vector.broadcast %54 : vector<8x1xf32> to vector<8x32xf32>
    %63 = arith.subf %46, %62 : vector<8x32xf32>
    %cst_46 = arith.constant 9.99999974E-6 : f32
    %64 = vector.broadcast %cst_46 : f32 to vector<8x1xf32>
    %65 = arith.addf %61, %64 : vector<8x1xf32>
    %66 = math.rsqrt %65 : vector<8x1xf32>
    %67 = vector.broadcast %66 : vector<8x1xf32> to vector<8x32xf32>
    %68 = arith.mulf %63, %67 : vector<8x32xf32>
    %69 = vector.broadcast %48 : vector<1x32xf32> to vector<8x32xf32>
    %70 = arith.mulf %68, %69 : vector<8x32xf32>
    %71 = vector.broadcast %50 : vector<1x32xf32> to vector<8x32xf32>
    %72 = arith.addf %70, %71 : vector<8x32xf32>
    %c0_47 = arith.constant 0 : index
    %c0_48 = arith.constant 0 : index
    %c0_49 = arith.constant 0 : index
    %73 = vector.load %arg11[%c0_47, %c0_48, %c0_49] : memref<2x32x64xf32, #tpu.memory_space<vmem>>, vector<1x32x64xf32>
    %74 = vector.shape_cast %73 : vector<1x32x64xf32> to vector<32x64xf32>
    %cst_50 = arith.constant dense<0.000000e+00> : vector<8x64xf32>
    %75 = tpu.matmul %72, %74, %cst_50 {dimension_numbers = #tpu.dot_dimension_numbers<[1], [0], [0], [1], [0, 0, 1, 1], [], []>} : vector<8x32xf32>, vector<32x64xf32>, vector<8x64xf32> -> vector<8x64xf32>
    %c0_51 = arith.constant 0 : index
    %c0_52 = arith.constant 0 : index
    %c0_53 = arith.constant 0 : index
    %76 = vector.load %arg12[%c0_51, %c0_52, %c0_53] : memref<2x1x64xf32, #tpu.memory_space<vmem>>, vector<1x1x64xf32>
    %77 = vector.shape_cast %76 : vector<1x1x64xf32> to vector<1x64xf32>
    %78 = vector.broadcast %77 : vector<1x64xf32> to vector<8x64xf32>
    %79 = arith.addf %75, %78 : vector<8x64xf32>
    %cst_54 = arith.constant 0.000000e+00 : f32
    %80 = vector.broadcast %cst_54 : f32 to vector<8x64xf32>
    %81 = arith.maximumf %79, %80 : vector<8x64xf32>
    %c0_55 = arith.constant 0 : index
    %c0_56 = arith.constant 0 : index
    %c0_57 = arith.constant 0 : index
    %82 = vector.load %arg13[%c0_55, %c0_56, %c0_57] : memref<2x64x32xf32, #tpu.memory_space<vmem>>, vector<1x64x32xf32>
    %83 = vector.shape_cast %82 : vector<1x64x32xf32> to vector<64x32xf32>
    %cst_58 = arith.constant dense<0.000000e+00> : vector<8x32xf32>
    %84 = tpu.matmul %81, %83, %cst_58 {dimension_numbers = #tpu.dot_dimension_numbers<[1], [0], [0], [1], [0, 0, 1, 1], [], []>} : vector<8x64xf32>, vector<64x32xf32>, vector<8x32xf32> -> vector<8x32xf32>
    %c0_59 = arith.constant 0 : index
    %c0_60 = arith.constant 0 : index
    %c0_61 = arith.constant 0 : index
    %85 = vector.load %arg14[%c0_59, %c0_60, %c0_61] : memref<2x1x32xf32, #tpu.memory_space<vmem>>, vector<1x1x32xf32>
    %86 = vector.shape_cast %85 : vector<1x1x32xf32> to vector<1x32xf32>
    %87 = vector.broadcast %86 : vector<1x32xf32> to vector<8x32xf32>
    %88 = arith.addf %84, %87 : vector<8x32xf32>
    %89 = arith.addf %72, %88 : vector<8x32xf32>
    %c0_62 = arith.constant 0 : index
    %c0_63 = arith.constant 0 : index
    %c0_64 = arith.constant 0 : index
    %90 = vector.load %arg15[%c0_62, %c0_63, %c0_64] : memref<2x1x32xf32, #tpu.memory_space<vmem>>, vector<1x1x32xf32>
    %91 = vector.shape_cast %90 : vector<1x1x32xf32> to vector<1x32xf32>
    %c0_65 = arith.constant 0 : index
    %c0_66 = arith.constant 0 : index
    %c0_67 = arith.constant 0 : index
    %92 = vector.load %arg16[%c0_65, %c0_66, %c0_67] : memref<2x1x32xf32, #tpu.memory_space<vmem>>, vector<1x1x32xf32>
    %93 = vector.shape_cast %92 : vector<1x1x32xf32> to vector<1x32xf32>
    %cst_68 = arith.constant dense<0.000000e+00> : vector<8xf32>
    %94 = vector.multi_reduction <add>, %89, %cst_68 [1] : vector<8x32xf32> to vector<8xf32>
    %95 = vector.shape_cast %94 : vector<8xf32> to vector<8x1xf32>
    %cst_69 = arith.constant 3.200000e+01 : f32
    %96 = vector.broadcast %cst_69 : f32 to vector<8x1xf32>
    %97 = arith.divf %95, %96 : vector<8x1xf32>
    %98 = vector.broadcast %97 : vector<8x1xf32> to vector<8x32xf32>
    %99 = arith.subf %89, %98 : vector<8x32xf32>
    %100 = arith.mulf %99, %99 : vector<8x32xf32>
    %cst_70 = arith.constant dense<0.000000e+00> : vector<8xf32>
    %101 = vector.multi_reduction <add>, %100, %cst_70 [1] : vector<8x32xf32> to vector<8xf32>
    %102 = vector.shape_cast %101 : vector<8xf32> to vector<8x1xf32>
    %cst_71 = arith.constant 3.200000e+01 : f32
    %103 = vector.broadcast %cst_71 : f32 to vector<8x1xf32>
    %104 = arith.divf %102, %103 : vector<8x1xf32>
    %105 = vector.broadcast %97 : vector<8x1xf32> to vector<8x32xf32>
    %106 = arith.subf %89, %105 : vector<8x32xf32>
    %cst_72 = arith.constant 9.99999974E-6 : f32
    %107 = vector.broadcast %cst_72 : f32 to vector<8x1xf32>
    %108 = arith.addf %104, %107 : vector<8x1xf32>
    %109 = math.rsqrt %108 : vector<8x1xf32>
    %110 = vector.broadcast %109 : vector<8x1xf32> to vector<8x32xf32>
    %111 = arith.mulf %106, %110 : vector<8x32xf32>
    %112 = vector.broadcast %91 : vector<1x32xf32> to vector<8x32xf32>
    %113 = arith.mulf %111, %112 : vector<8x32xf32>
    %114 = vector.broadcast %93 : vector<1x32xf32> to vector<8x32xf32>
    %115 = arith.addf %113, %114 : vector<8x32xf32>
    %116 = arith.addf %115, %3 : vector<8x32xf32>
    %117 = vector.shape_cast %116 : vector<8x32xf32> to vector<1x8x32xf32>
    %118 = vector.broadcast %117 : vector<1x8x32xf32> to vector<4x8x32xf32>
    %119 = vector.shape_cast %115 : vector<8x32xf32> to vector<1x8x32xf32>
    %120 = vector.broadcast %119 : vector<1x8x32xf32> to vector<4x8x32xf32>
    %c1 = arith.constant 1 : index
    %c0_73 = arith.constant 0 : index
    %c0_74 = arith.constant 0 : index
    %c0_75 = arith.constant 0 : index
    %121 = vector.load %arg3[%c1, %c0_73, %c0_74, %c0_75] : memref<2x4x32x16xf32, #tpu.memory_space<vmem>>, vector<1x4x32x16xf32>
    %122 = vector.shape_cast %121 : vector<1x4x32x16xf32> to vector<4x32x16xf32>
    "tpu.trace_start"() <{level = 10 : i32, message = "hsd,hde->hse"}> : () -> ()
    %cst_76 = arith.constant dense<0.000000e+00> : vector<4x8x16xf32>
    %123 = tpu.matmul %118, %122, %cst_76 {dimension_numbers = #tpu.dot_dimension_numbers<[2], [1], [1], [2], [0, 0, 0, 1, 1, 2], [0], [0]>} : vector<4x8x32xf32>, vector<4x32x16xf32>, vector<4x8x16xf32> -> vector<4x8x16xf32>
    "tpu.trace_stop"() : () -> ()
    %c1_77 = arith.constant 1 : index
    %c0_78 = arith.constant 0 : index
    %c0_79 = arith.constant 0 : index
    %c0_80 = arith.constant 0 : index
    %124 = vector.load %arg4[%c1_77, %c0_78, %c0_79, %c0_80] : memref<2x4x1x16xf32, #tpu.memory_space<vmem>>, vector<1x4x1x16xf32>
    %125 = vector.shape_cast %124 : vector<1x4x1x16xf32> to vector<4x1x16xf32>
    %126 = vector.broadcast %125 : vector<4x1x16xf32> to vector<4x8x16xf32>
    %127 = arith.addf %123, %126 : vector<4x8x16xf32>
    %128 = vector.extract_strided_slice %127 {offsets = [0, 0, 0], sizes = [4, 8, 8], strides = [1, 1, 1]} : vector<4x8x16xf32> to vector<4x8x8xf32>
    %cst_81 = arith.constant 0.353553385 : f32
    %129 = vector.broadcast %cst_81 : f32 to vector<4x8x8xf32>
    %130 = arith.mulf %128, %129 : vector<4x8x8xf32>
    %131 = vector.extract_strided_slice %127 {offsets = [0, 0, 8], sizes = [4, 8, 8], strides = [1, 1, 1]} : vector<4x8x16xf32> to vector<4x8x8xf32>
    %c1_82 = arith.constant 1 : index
    %c0_83 = arith.constant 0 : index
    %c0_84 = arith.constant 0 : index
    %c0_85 = arith.constant 0 : index
    %132 = vector.load %arg5[%c1_82, %c0_83, %c0_84, %c0_85] : memref<2x4x32x8xf32, #tpu.memory_space<vmem>>, vector<1x4x32x8xf32>
    %133 = vector.shape_cast %132 : vector<1x4x32x8xf32> to vector<4x32x8xf32>
    "tpu.trace_start"() <{level = 10 : i32, message = "hsd,hde->hse"}> : () -> ()
    %cst_86 = arith.constant dense<0.000000e+00> : vector<4x8x8xf32>
    %134 = tpu.matmul %120, %133, %cst_86 {dimension_numbers = #tpu.dot_dimension_numbers<[2], [1], [1], [2], [0, 0, 0, 1, 1, 2], [0], [0]>} : vector<4x8x32xf32>, vector<4x32x8xf32>, vector<4x8x8xf32> -> vector<4x8x8xf32>
    "tpu.trace_stop"() : () -> ()
    %c1_87 = arith.constant 1 : index
    %c0_88 = arith.constant 0 : index
    %c0_89 = arith.constant 0 : index
    %c0_90 = arith.constant 0 : index
    %135 = vector.load %arg6[%c1_87, %c0_88, %c0_89, %c0_90] : memref<2x4x1x8xf32, #tpu.memory_space<vmem>>, vector<1x4x1x8xf32>
    %136 = vector.shape_cast %135 : vector<1x4x1x8xf32> to vector<4x1x8xf32>
    %137 = vector.broadcast %136 : vector<4x1x8xf32> to vector<4x8x8xf32>
    %138 = arith.addf %134, %137 : vector<4x8x8xf32>
    "tpu.trace_start"() <{level = 10 : i32, message = "hqd,hkd->hqk"}> : () -> ()
    %cst_91 = arith.constant dense<0.000000e+00> : vector<4x8x8xf32>
    %139 = tpu.matmul %130, %131, %cst_91 {dimension_numbers = #tpu.dot_dimension_numbers<[2], [2], [1], [1], [0, 0, 0, 1, 1, 1], [0], [0]>} : vector<4x8x8xf32>, vector<4x8x8xf32>, vector<4x8x8xf32> -> vector<4x8x8xf32>
    "tpu.trace_stop"() : () -> ()
    %cst_92 = arith.constant dense<0xFF800000> : vector<4x8xf32>
    %140 = vector.multi_reduction <maximumf>, %139, %cst_92 [2] : vector<4x8x8xf32> to vector<4x8xf32>
    %141 = vector.shape_cast %140 : vector<4x8xf32> to vector<4x8x1xf32>
    %142 = vector.broadcast %141 : vector<4x8x1xf32> to vector<4x8x8xf32>
    %143 = arith.subf %139, %142 : vector<4x8x8xf32>
    %144 = math.exp %143 : vector<4x8x8xf32>
    %cst_93 = arith.constant dense<0.000000e+00> : vector<4x8xf32>
    %145 = vector.multi_reduction <add>, %144, %cst_93 [2] : vector<4x8x8xf32> to vector<4x8xf32>
    %146 = vector.shape_cast %145 : vector<4x8xf32> to vector<4x8x1xf32>
    %147 = vector.broadcast %146 : vector<4x8x1xf32> to vector<4x8x8xf32>
    %148 = arith.divf %144, %147 : vector<4x8x8xf32>
    "tpu.trace_start"() <{level = 10 : i32, message = "hqk,hkd->hqd"}> : () -> ()
    %cst_94 = arith.constant dense<0.000000e+00> : vector<4x8x8xf32>
    %149 = tpu.matmul %148, %138, %cst_94 {dimension_numbers = #tpu.dot_dimension_numbers<[2], [1], [1], [2], [0, 0, 0, 1, 1, 2], [0], [0]>} : vector<4x8x8xf32>, vector<4x8x8xf32>, vector<4x8x8xf32> -> vector<4x8x8xf32>
    "tpu.trace_stop"() : () -> ()
    %c1_95 = arith.constant 1 : index
    %c0_96 = arith.constant 0 : index
    %c0_97 = arith.constant 0 : index
    %c0_98 = arith.constant 0 : index
    %150 = vector.load %arg7[%c1_95, %c0_96, %c0_97, %c0_98] : memref<2x4x8x32xf32, #tpu.memory_space<vmem>>, vector<1x4x8x32xf32>
    %151 = vector.shape_cast %150 : vector<1x4x8x32xf32> to vector<4x8x32xf32>
    "tpu.trace_start"() <{level = 10 : i32, message = "hqd,hde->hqe"}> : () -> ()
    %cst_99 = arith.constant dense<0.000000e+00> : vector<4x8x32xf32>
    %152 = tpu.matmul %149, %151, %cst_99 {dimension_numbers = #tpu.dot_dimension_numbers<[2], [1], [1], [2], [0, 0, 0, 1, 1, 2], [0], [0]>} : vector<4x8x8xf32>, vector<4x8x32xf32>, vector<4x8x32xf32> -> vector<4x8x32xf32>
    "tpu.trace_stop"() : () -> ()
    %cst_100 = arith.constant dense<0.000000e+00> : vector<8x32xf32>
    %153 = vector.multi_reduction <add>, %152, %cst_100 [0] : vector<4x8x32xf32> to vector<8x32xf32>
    %c1_101 = arith.constant 1 : index
    %c0_102 = arith.constant 0 : index
    %c0_103 = arith.constant 0 : index
    %154 = vector.load %arg8[%c1_101, %c0_102, %c0_103] : memref<2x1x32xf32, #tpu.memory_space<vmem>>, vector<1x1x32xf32>
    %155 = vector.shape_cast %154 : vector<1x1x32xf32> to vector<1x32xf32>
    %156 = vector.broadcast %155 : vector<1x32xf32> to vector<8x32xf32>
    %157 = arith.addf %153, %156 : vector<8x32xf32>
    %158 = arith.addf %115, %157 : vector<8x32xf32>
    %c1_104 = arith.constant 1 : index
    %c0_105 = arith.constant 0 : index
    %c0_106 = arith.constant 0 : index
    %159 = vector.load %arg9[%c1_104, %c0_105, %c0_106] : memref<2x1x32xf32, #tpu.memory_space<vmem>>, vector<1x1x32xf32>
    %160 = vector.shape_cast %159 : vector<1x1x32xf32> to vector<1x32xf32>
    %c1_107 = arith.constant 1 : index
    %c0_108 = arith.constant 0 : index
    %c0_109 = arith.constant 0 : index
    %161 = vector.load %arg10[%c1_107, %c0_108, %c0_109] : memref<2x1x32xf32, #tpu.memory_space<vmem>>, vector<1x1x32xf32>
    %162 = vector.shape_cast %161 : vector<1x1x32xf32> to vector<1x32xf32>
    %cst_110 = arith.constant dense<0.000000e+00> : vector<8xf32>
    %163 = vector.multi_reduction <add>, %158, %cst_110 [1] : vector<8x32xf32> to vector<8xf32>
    %164 = vector.shape_cast %163 : vector<8xf32> to vector<8x1xf32>
    %cst_111 = arith.constant 3.200000e+01 : f32
    %165 = vector.broadcast %cst_111 : f32 to vector<8x1xf32>
    %166 = arith.divf %164, %165 : vector<8x1xf32>
    %167 = vector.broadcast %166 : vector<8x1xf32> to vector<8x32xf32>
    %168 = arith.subf %158, %167 : vector<8x32xf32>
    %169 = arith.mulf %168, %168 : vector<8x32xf32>
    %cst_112 = arith.constant dense<0.000000e+00> : vector<8xf32>
    %170 = vector.multi_reduction <add>, %169, %cst_112 [1] : vector<8x32xf32> to vector<8xf32>
    %171 = vector.shape_cast %170 : vector<8xf32> to vector<8x1xf32>
    %cst_113 = arith.constant 3.200000e+01 : f32
    %172 = vector.broadcast %cst_113 : f32 to vector<8x1xf32>
    %173 = arith.divf %171, %172 : vector<8x1xf32>
    %174 = vector.broadcast %166 : vector<8x1xf32> to vector<8x32xf32>
    %175 = arith.subf %158, %174 : vector<8x32xf32>
    %cst_114 = arith.constant 9.99999974E-6 : f32
    %176 = vector.broadcast %cst_114 : f32 to vector<8x1xf32>
    %177 = arith.addf %173, %176 : vector<8x1xf32>
    %178 = math.rsqrt %177 : vector<8x1xf32>
    %179 = vector.broadcast %178 : vector<8x1xf32> to vector<8x32xf32>
    %180 = arith.mulf %175, %179 : vector<8x32xf32>
    %181 = vector.broadcast %160 : vector<1x32xf32> to vector<8x32xf32>
    %182 = arith.mulf %180, %181 : vector<8x32xf32>
    %183 = vector.broadcast %162 : vector<1x32xf32> to vector<8x32xf32>
    %184 = arith.addf %182, %183 : vector<8x32xf32>
    %c1_115 = arith.constant 1 : index
    %c0_116 = arith.constant 0 : index
    %c0_117 = arith.constant 0 : index
    %185 = vector.load %arg11[%c1_115, %c0_116, %c0_117] : memref<2x32x64xf32, #tpu.memory_space<vmem>>, vector<1x32x64xf32>
    %186 = vector.shape_cast %185 : vector<1x32x64xf32> to vector<32x64xf32>
    %cst_118 = arith.constant dense<0.000000e+00> : vector<8x64xf32>
    %187 = tpu.matmul %184, %186, %cst_118 {dimension_numbers = #tpu.dot_dimension_numbers<[1], [0], [0], [1], [0, 0, 1, 1], [], []>} : vector<8x32xf32>, vector<32x64xf32>, vector<8x64xf32> -> vector<8x64xf32>
    %c1_119 = arith.constant 1 : index
    %c0_120 = arith.constant 0 : index
    %c0_121 = arith.constant 0 : index
    %188 = vector.load %arg12[%c1_119, %c0_120, %c0_121] : memref<2x1x64xf32, #tpu.memory_space<vmem>>, vector<1x1x64xf32>
    %189 = vector.shape_cast %188 : vector<1x1x64xf32> to vector<1x64xf32>
    %190 = vector.broadcast %189 : vector<1x64xf32> to vector<8x64xf32>
    %191 = arith.addf %187, %190 : vector<8x64xf32>
    %cst_122 = arith.constant 0.000000e+00 : f32
    %192 = vector.broadcast %cst_122 : f32 to vector<8x64xf32>
    %193 = arith.maximumf %191, %192 : vector<8x64xf32>
    %c1_123 = arith.constant 1 : index
    %c0_124 = arith.constant 0 : index
    %c0_125 = arith.constant 0 : index
    %194 = vector.load %arg13[%c1_123, %c0_124, %c0_125] : memref<2x64x32xf32, #tpu.memory_space<vmem>>, vector<1x64x32xf32>
    %195 = vector.shape_cast %194 : vector<1x64x32xf32> to vector<64x32xf32>
    %cst_126 = arith.constant dense<0.000000e+00> : vector<8x32xf32>
    %196 = tpu.matmul %193, %195, %cst_126 {dimension_numbers = #tpu.dot_dimension_numbers<[1], [0], [0], [1], [0, 0, 1, 1], [], []>} : vector<8x64xf32>, vector<64x32xf32>, vector<8x32xf32> -> vector<8x32xf32>
    %c1_127 = arith.constant 1 : index
    %c0_128 = arith.constant 0 : index
    %c0_129 = arith.constant 0 : index
    %197 = vector.load %arg14[%c1_127, %c0_128, %c0_129] : memref<2x1x32xf32, #tpu.memory_space<vmem>>, vector<1x1x32xf32>
    %198 = vector.shape_cast %197 : vector<1x1x32xf32> to vector<1x32xf32>
    %199 = vector.broadcast %198 : vector<1x32xf32> to vector<8x32xf32>
    %200 = arith.addf %196, %199 : vector<8x32xf32>
    %201 = arith.addf %184, %200 : vector<8x32xf32>
    %c1_130 = arith.constant 1 : index
    %c0_131 = arith.constant 0 : index
    %c0_132 = arith.constant 0 : index
    %202 = vector.load %arg15[%c1_130, %c0_131, %c0_132] : memref<2x1x32xf32, #tpu.memory_space<vmem>>, vector<1x1x32xf32>
    %203 = vector.shape_cast %202 : vector<1x1x32xf32> to vector<1x32xf32>
    %c1_133 = arith.constant 1 : index
    %c0_134 = arith.constant 0 : index
    %c0_135 = arith.constant 0 : index
    %204 = vector.load %arg16[%c1_133, %c0_134, %c0_135] : memref<2x1x32xf32, #tpu.memory_space<vmem>>, vector<1x1x32xf32>
    %205 = vector.shape_cast %204 : vector<1x1x32xf32> to vector<1x32xf32>
    %cst_136 = arith.constant dense<0.000000e+00> : vector<8xf32>
    %206 = vector.multi_reduction <add>, %201, %cst_136 [1] : vector<8x32xf32> to vector<8xf32>
    %207 = vector.shape_cast %206 : vector<8xf32> to vector<8x1xf32>
    %cst_137 = arith.constant 3.200000e+01 : f32
    %208 = vector.broadcast %cst_137 : f32 to vector<8x1xf32>
    %209 = arith.divf %207, %208 : vector<8x1xf32>
    %210 = vector.broadcast %209 : vector<8x1xf32> to vector<8x32xf32>
    %211 = arith.subf %201, %210 : vector<8x32xf32>
    %212 = arith.mulf %211, %211 : vector<8x32xf32>
    %cst_138 = arith.constant dense<0.000000e+00> : vector<8xf32>
    %213 = vector.multi_reduction <add>, %212, %cst_138 [1] : vector<8x32xf32> to vector<8xf32>
    %214 = vector.shape_cast %213 : vector<8xf32> to vector<8x1xf32>
    %cst_139 = arith.constant 3.200000e+01 : f32
    %215 = vector.broadcast %cst_139 : f32 to vector<8x1xf32>
    %216 = arith.divf %214, %215 : vector<8x1xf32>
    %217 = vector.broadcast %209 : vector<8x1xf32> to vector<8x32xf32>
    %218 = arith.subf %201, %217 : vector<8x32xf32>
    %cst_140 = arith.constant 9.99999974E-6 : f32
    %219 = vector.broadcast %cst_140 : f32 to vector<8x1xf32>
    %220 = arith.addf %216, %219 : vector<8x1xf32>
    %221 = math.rsqrt %220 : vector<8x1xf32>
    %222 = vector.broadcast %221 : vector<8x1xf32> to vector<8x32xf32>
    %223 = arith.mulf %218, %222 : vector<8x32xf32>
    %224 = vector.broadcast %203 : vector<1x32xf32> to vector<8x32xf32>
    %225 = arith.mulf %223, %224 : vector<8x32xf32>
    %226 = vector.broadcast %205 : vector<1x32xf32> to vector<8x32xf32>
    %227 = arith.addf %225, %226 : vector<8x32xf32>
    %c0_141 = arith.constant 0 : index
    %c0_142 = arith.constant 0 : index
    %228 = vector.load %arg17[%c0_141, %c0_142] : memref<1x32xf32, #tpu.memory_space<vmem>>, vector<1x32xf32>
    %c0_143 = arith.constant 0 : index
    %c0_144 = arith.constant 0 : index
    %229 = vector.load %arg18[%c0_143, %c0_144] : memref<1x32xf32, #tpu.memory_space<vmem>>, vector<1x32xf32>
    %cst_145 = arith.constant dense<0.000000e+00> : vector<8xf32>
    %230 = vector.multi_reduction <add>, %227, %cst_145 [1] : vector<8x32xf32> to vector<8xf32>
    %231 = vector.shape_cast %230 : vector<8xf32> to vector<8x1xf32>
    %cst_146 = arith.constant 3.200000e+01 : f32
    %232 = vector.broadcast %cst_146 : f32 to vector<8x1xf32>
    %233 = arith.divf %231, %232 : vector<8x1xf32>
    %234 = vector.broadcast %233 : vector<8x1xf32> to vector<8x32xf32>
    %235 = arith.subf %227, %234 : vector<8x32xf32>
    %236 = arith.mulf %235, %235 : vector<8x32xf32>
    %cst_147 = arith.constant dense<0.000000e+00> : vector<8xf32>
    %237 = vector.multi_reduction <add>, %236, %cst_147 [1] : vector<8x32xf32> to vector<8xf32>
    %238 = vector.shape_cast %237 : vector<8xf32> to vector<8x1xf32>
    %cst_148 = arith.constant 3.200000e+01 : f32
    %239 = vector.broadcast %cst_148 : f32 to vector<8x1xf32>
    %240 = arith.divf %238, %239 : vector<8x1xf32>
    %241 = vector.broadcast %233 : vector<8x1xf32> to vector<8x32xf32>
    %242 = arith.subf %227, %241 : vector<8x32xf32>
    %cst_149 = arith.constant 9.99999974E-6 : f32
    %243 = vector.broadcast %cst_149 : f32 to vector<8x1xf32>
    %244 = arith.addf %240, %243 : vector<8x1xf32>
    %245 = math.rsqrt %244 : vector<8x1xf32>
    %246 = vector.broadcast %245 : vector<8x1xf32> to vector<8x32xf32>
    %247 = arith.mulf %242, %246 : vector<8x32xf32>
    %248 = vector.broadcast %228 : vector<1x32xf32> to vector<8x32xf32>
    %249 = arith.mulf %247, %248 : vector<8x32xf32>
    %250 = vector.broadcast %229 : vector<1x32xf32> to vector<8x32xf32>
    %251 = arith.addf %249, %250 : vector<8x32xf32>
    %252 = vector.shape_cast %251 : vector<8x32xf32> to vector<1x8x32xf32>
    %c0_150 = arith.constant 0 : index
    %c0_151 = arith.constant 0 : index
    %c0_152 = arith.constant 0 : index
    %253 = vector.load %arg19[%c0_150, %c0_151, %c0_152] : memref<1x8x32xf32, #tpu.memory_space<vmem>>, vector<1x8x32xf32>
    tpu.vector_store %arg19[%c0_150, %c0_151, %c0_152], %252 {strides = array<i32>} : memref<1x8x32xf32, #tpu.memory_space<vmem>>, vector<1x8x32xf32>,
    return
  }
  func.func @transform_0(%arg0: i32) -> (i32, i32, i32) {
    %c0_i32 = arith.constant 0 : i32
    %c0_i32_0 = arith.constant 0 : i32
    %c0_i32_1 = arith.constant 0 : i32
    return %arg0, %c0_i32, %c0_i32_0 : i32, i32, i32
  }
  func.func @transform_1(%arg0: i32) -> (i32, i32, i32) {
    %c0_i32 = arith.constant 0 : i32
    %c0_i32_0 = arith.constant 0 : i32
    %c0_i32_1 = arith.constant 0 : i32
    return %arg0, %c0_i32, %c0_i32_0 : i32, i32, i32
  }
  func.func @transform_2(%arg0: i32) -> (i32, i32, i32, i32) {
    %c0_i32 = arith.constant 0 : i32
    %c0_i32_0 = arith.constant 0 : i32
    %c0_i32_1 = arith.constant 0 : i32
    %c0_i32_2 = arith.constant 0 : i32
    %c0_i32_3 = arith.constant 0 : i32
    return %c0_i32, %c0_i32_0, %c0_i32_1, %c0_i32_2 : i32, i32, i32, i32
  }
  func.func @transform_3(%arg0: i32) -> (i32, i32, i32, i32) {
    %c0_i32 = arith.constant 0 : i32
    %c0_i32_0 = arith.constant 0 : i32
    %c0_i32_1 = arith.constant 0 : i32
    %c0_i32_2 = arith.constant 0 : i32
    %c0_i32_3 = arith.constant 0 : i32
    return %c0_i32, %c0_i32_0, %c0_i32_1, %c0_i32_2 : i32, i32, i32, i32
  }
  func.func @transform_4(%arg0: i32) -> (i32, i32, i32, i32) {
    %c0_i32 = arith.constant 0 : i32
    %c0_i32_0 = arith.constant 0 : i32
    %c0_i32_1 = arith.constant 0 : i32
    %c0_i32_2 = arith.constant 0 : i32
    %c0_i32_3 = arith.constant 0 : i32
    return %c0_i32, %c0_i32_0, %c0_i32_1, %c0_i32_2 : i32, i32, i32, i32
  }
  func.func @transform_5(%arg0: i32) -> (i32, i32, i32, i32) {
    %c0_i32 = arith.constant 0 : i32
    %c0_i32_0 = arith.constant 0 : i32
    %c0_i32_1 = arith.constant 0 : i32
    %c0_i32_2 = arith.constant 0 : i32
    %c0_i32_3 = arith.constant 0 : i32
    return %c0_i32, %c0_i32_0, %c0_i32_1, %c0_i32_2 : i32, i32, i32, i32
  }
  func.func @transform_6(%arg0: i32) -> (i32, i32, i32, i32) {
    %c0_i32 = arith.constant 0 : i32
    %c0_i32_0 = arith.constant 0 : i32
    %c0_i32_1 = arith.constant 0 : i32
    %c0_i32_2 = arith.constant 0 : i32
    %c0_i32_3 = arith.constant 0 : i32
    return %c0_i32, %c0_i32_0, %c0_i32_1, %c0_i32_2 : i32, i32, i32, i32
  }
  func.func @transform_7(%arg0: i32) -> (i32, i32, i32) {
    %c0_i32 = arith.constant 0 : i32
    %c0_i32_0 = arith.constant 0 : i32
    %c0_i32_1 = arith.constant 0 : i32
    %c0_i32_2 = arith.constant 0 : i32
    return %c0_i32, %c0_i32_0, %c0_i32_1 : i32, i32, i32
  }
  func.func @transform_8(%arg0: i32) -> (i32, i32, i32) {
    %c0_i32 = arith.constant 0 : i32
    %c0_i32_0 = arith.constant 0 : i32
    %c0_i32_1 = arith.constant 0 : i32
    %c0_i32_2 = arith.constant 0 : i32
    return %c0_i32, %c0_i32_0, %c0_i32_1 : i32, i32, i32
  }
  func.func @transform_9(%arg0: i32) -> (i32, i32, i32) {
    %c0_i32 = arith.constant 0 : i32
    %c0_i32_0 = arith.constant 0 : i32
    %c0_i32_1 = arith.constant 0 : i32
    %c0_i32_2 = arith.constant 0 : i32
    return %c0_i32, %c0_i32_0, %c0_i32_1 : i32, i32, i32
  }
  func.func @transform_10(%arg0: i32) -> (i32, i32, i32) {
    %c0_i32 = arith.constant 0 : i32
    %c0_i32_0 = arith.constant 0 : i32
    %c0_i32_1 = arith.constant 0 : i32
    %c0_i32_2 = arith.constant 0 : i32
    return %c0_i32, %c0_i32_0, %c0_i32_1 : i32, i32, i32
  }
  func.func @transform_11(%arg0: i32) -> (i32, i32, i32) {
    %c0_i32 = arith.constant 0 : i32
    %c0_i32_0 = arith.constant 0 : i32
    %c0_i32_1 = arith.constant 0 : i32
    %c0_i32_2 = arith.constant 0 : i32
    return %c0_i32, %c0_i32_0, %c0_i32_1 : i32, i32, i32
  }
  func.func @transform_12(%arg0: i32) -> (i32, i32, i32) {
    %c0_i32 = arith.constant 0 : i32
    %c0_i32_0 = arith.constant 0 : i32
    %c0_i32_1 = arith.constant 0 : i32
    %c0_i32_2 = arith.constant 0 : i32
    return %c0_i32, %c0_i32_0, %c0_i32_1 : i32, i32, i32
  }
  func.func @transform_13(%arg0: i32) -> (i32, i32, i32) {
    %c0_i32 = arith.constant 0 : i32
    %c0_i32_0 = arith.constant 0 : i32
    %c0_i32_1 = arith.constant 0 : i32
    %c0_i32_2 = arith.constant 0 : i32
    return %c0_i32, %c0_i32_0, %c0_i32_1 : i32, i32, i32
  }
  func.func @transform_14(%arg0: i32) -> (i32, i32, i32) {
    %c0_i32 = arith.constant 0 : i32
    %c0_i32_0 = arith.constant 0 : i32
    %c0_i32_1 = arith.constant 0 : i32
    %c0_i32_2 = arith.constant 0 : i32
    return %c0_i32, %c0_i32_0, %c0_i32_1 : i32, i32, i32
  }
  func.func @transform_15(%arg0: i32) -> (i32, i32, i32) {
    %c0_i32 = arith.constant 0 : i32
    %c0_i32_0 = arith.constant 0 : i32
    %c0_i32_1 = arith.constant 0 : i32
    %c0_i32_2 = arith.constant 0 : i32
    return %c0_i32, %c0_i32_0, %c0_i32_1 : i32, i32, i32
  }
  func.func @transform_16(%arg0: i32) -> (i32, i32) {
    %c0_i32 = arith.constant 0 : i32
    %c0_i32_0 = arith.constant 0 : i32
    %c0_i32_1 = arith.constant 0 : i32
    return %c0_i32, %c0_i32_0 : i32, i32
  }
  func.func @transform_17(%arg0: i32) -> (i32, i32) {
    %c0_i32 = arith.constant 0 : i32
    %c0_i32_0 = arith.constant 0 : i32
    %c0_i32_1 = arith.constant 0 : i32
    return %c0_i32, %c0_i32_0 : i32, i32
  }
  func.func @transform_18(%arg0: i32) -> (i32, i32, i32) {
    %c0_i32 = arith.constant 0 : i32
    %c0_i32_0 = arith.constant 0 : i32
    %c0_i32_1 = arith.constant 0 : i32
    return %arg0, %c0_i32, %c0_i32_0 : i32, i32, i32
  }
}

</mosaic_0001>

<bundles_post_ra>
// kernel: tpu_custom_call.1
= control target key start
LH: loop header
LB: loop body
LE: loop exit
PB: predicated region body
PF: predicated region fallthrough
CT: control target
= control target key end

     0   :  { %s6246_s0 = inlined_call_operand.vmem [shape: f32[2,8,32], index: 0, kind: input, shape index: {}]   ;;  %s6247_s1 = inlined_call_operand.vmem [shape: f32[2,8,32], index: 1, kind: input, shape index: {}]   ;;  %s6248_s2 = inlined_call_operand.vmem [shape: f32[2,4,32,16], index: 2, kind: input, shape index: {}]   ;;  %s6249_s3 = inlined_call_operand.vmem [shape: f32[2,4,1,16], index: 3, kind: input, shape index: {}]   ;;  %s6250_s4 = inlined_call_operand.vmem [shape: f32[2,4,32,8], index: 4, kind: input, shape index: {}]   ;;  %s6251_s5 = inlined_call_operand.vmem [shape: f32[2,4,1,8], index: 5, kind: input, shape index: {}]   ;;  %s6252_s6 = inlined_call_operand.vmem [shape: f32[2,4,8,32], index: 6, kind: input, shape index: {}]   ;;  %s6253_s7 = inlined_call_operand.vmem [shape: f32[2,1,32], index: 7, kind: input, shape index: {}]   ;;  %s6254_s8 = inlined_call_operand.vmem [shape: f32[2,1,32], index: 8, kind: input, shape index: {}]   ;;  %s6255_s9 = inlined_call_operand.vmem [shape: f32[2,1,32], index: 9, kind: input, shape index: {}]   ;;  %s6256_s10 = inlined_call_operand.vmem [shape: f32[2,32,64], index: 10, kind: input, shape index: {}]   ;;  %s6257_s11 = inlined_call_operand.vmem [shape: f32[2,1,64], index: 11, kind: input, shape index: {}]   ;;  %s6258_s12 = inlined_call_operand.vmem [shape: f32[2,64,32], index: 12, kind: input, shape index: {}]   ;;  %s6259_s13 = inlined_call_operand.vmem [shape: f32[2,1,32], index: 13, kind: input, shape index: {}]   ;;  %s6260_s14 = inlined_call_operand.vmem [shape: f32[2,1,32], index: 14, kind: input, shape index: {}]   ;;  %s6261_s15 = inlined_call_operand.vmem [shape: f32[2,1,32], index: 15, kind: input, shape index: {}]   ;;  %s6262_s16 = inlined_call_operand.vmem [shape: f32[1,32], index: 16, kind: input, shape index: {}]   ;;  %s6263_s17 = inlined_call_operand.vmem [shape: f32[1,32], index: 17, kind: input, shape index: {}]   ;;  %s6264_s18 = inlined_call_operand.hbm [shape: f32[2,8,32], index: 18, kind: output, shape index: {}]  }
   0x1   :  { %6275 = sst [smem:[#allocation12_spill]] %s6246_s0 }
   0x2   :  { %6276 = sst [smem:[#allocation13_spill]] %s6247_s1 }
   0x3   :  { %6277 = sst [smem:[#allocation14_spill]] %s6248_s2 }
   0x4   :  { %6278 = sst [smem:[#allocation15_spill]] %s6249_s3 }
   0x5   :  { %6279 = sst [smem:[#allocation16_spill]] %s6262_s16 }
   0x6   :  { %6280 = sst [smem:[#allocation17_spill]] %s6263_s17 }
   0x7   :  { %6281 = sst [smem:[#allocation18_spill]] %s6264_s18 }
   0x8   :  { %23 = vsyncpa [#allocation3], 0 }
   0x9   :  { %25 = vsyncpa [#allocation3 + $0x1], 0  ;;  %s5476_s27 = smov 0   ;;  %s5478_s28 = smov 0  }
   0xa   :  { %s5480_s29 = smov 0   ;;  %s5482_s30 = smov 0  }
   0xb LB: > { %6282 = sst [smem:[#allocation5_spill]] %s5362_s27  ;;  %s5497_s0 = sadd.s32 4294967295, %s5374_s30   ;;  %s5374_s30 = sphi %s5482_s30, %s6302_s30   ;;  %s5370_s29 = sphi %s5480_s29, %s6304_s29   ;;  %s5366_s28 = sphi %s5478_s28, %s6306_s28   ;;  %s5362_s27 = sphi %s5476_s27, %s6305_s27  }
   0xc   : > { %6283 = sst [smem:[#allocation6_spill]] %s5370_s29  ;;  %s4425_s19 = sadd.s32 4294967294, %s5374_s30  }
   0xd   : > { %6284 = sst [smem:[#allocation7_spill]] %s5374_s30  ;;  %s5501_s1 = sadd.s32 1, %s5374_s30  }
   0xe   : > { %6285 = sst [smem:[#allocation8_spill]] %s5501_s1  ;;  %s426_s20 = sadd.s32 1, %s5370_s29 }
   0xf   : > { %s423_s21 = ssub.s32 %s5374_s30, %s5501_s1  ;;  %p436_p0 = scmp.ne.s32.totalorder %s5370_s29, %s5366_s28 }
  0x10   : > { %p424_p1 = scmp.eq.s32.totalorder %s423_s21, 0  ;;  %p437_p2 = scmp.eq.s32.totalorder %s5497_s0, 1 }
  0x11   : > { %p442_p3 = scmp.ne.s32.totalorder %s5366_s28, %s5362_s27  ;;  %p443_p4 = scmp.eq.s32.totalorder %s4425_s19, 1 }
  0x12   : > { %s5512_s22 = scalar_select %p424_p1, %s5370_s29, %s426_s20  }
  0x13   : > { %p5514_p5 = por %p437_p2, %p436_p0  ;;  %p5518_p6 = por %p443_p4, %p442_p3 }
  0x14   : > { %6286 = sst [smem:[#allocation9_spill]] %s5512_s22  ;;  %p4428_p7 = scmp.ge.s32.totalorder %s5374_s30, 1 }
  0x15   : > { %s6287_s2 = scalar_select %p5514_p5, 1, 0 }
  0x16   : > { %s6289_s23 = scalar_select %p5518_p6, 1, 0 }
  0x17   : > { %6288 = sst [smem:[#allocation10_spill]] %s6287_s2  ;;  %p523_p8 = scmp.lt.s32.totalorder %s5374_s30, 3 }
  0x18   : > { %6290 = sst [smem:[#allocation11_spill]] %s6289_s23 }
  0x19   : > { %p524_p9 = pnand %p4428_p7, %p523_p8 }
  0x1a   : > { %s6291_s26 = sld [smem:[#allocation14_spill]] (!%p524_p9)  ;;  %v5376_v3 = vmov (!%p524_p9), 0.0|0.0   ;;  %p580_p10 = scmp.lt.s32.totalorder (!%p524_p9), %s5497_s0, 1  ;;  %vm5377_vm0 = vmmov (!%p524_p9), 0   ;;  %v5378_v9 = vmov (!%p524_p9), 0.0   ;;  %vm635_vm1 = vcmask (!%p524_p9), 261120  }
  0x1b   : > { %527 = sbr.rel (%p524_p9) target bundleno = 5093 (0x13e5), region = 92  ;;  %5095 = vmatprep.subr.bf16.mxu0 (!%p524_p9), %v5376_v3  ;;  %5101 = vmatprep.subr.bf16.mxu1 (!%p524_p9), %v5376_v3  ;;  %s6292_s17 = sld [smem:[#allocation12_spill]] (!%p524_p9)  ;;  %v923_v29 = vld [vmem:[%s6250_s4] sm:$0xff] (!%p524_p9)  ;;  %v924_v30 = vld [vmem:[%s6250_s4 + $0x8] sm:$0xff] (!%p524_p9)  ;;  %v925_v31 = vld [vmem:[%s6250_s4 + $0x10] sm:$0xff] (!%p524_p9)  ;;  %vm1253_vm2 = vcmask (!%p524_p9), 64512  }
  0x1c   : > { %4747 = vmatprep.mubr.msk.f32.mxu0 (!%p524_p9), %vm5377_vm0, %v5378_v9  ;;  %4758 = vmatprep.mubr.msk.f32.mxu1 (!%p524_p9), %vm5377_vm0, %v5378_v9  ;;  %s6293_s2 = sld [smem:[#allocation13_spill]] (!%p524_p9)  ;;  %v5120_v32 = vpack.c.bf16 (!%p524_p9), %v924_v30, %v923_v29  ;;  %v926_v33 = vld [vmem:[%s6250_s4 + $0x18] sm:$0xff] (!%p524_p9)  ;;  %v927_v34 = vld [vmem:[%s6250_s4 + $0x20] sm:$0xff] (!%p524_p9)  ;;  %v928_v35 = vld [vmem:[%s6250_s4 + $0x28] sm:$0xff] (!%p524_p9)  ;;  %s6294_s3 = sld [smem:[#allocation15_spill]] (!%p524_p9)  ;;  %vm2341_vm3 = vcmask (!%p524_p9), 523264  }
  0x1d   : > { %v5123_v36 = vpack.c.bf16 (!%p524_p9), %v926_v33, %v925_v31  ;;  %v5126_v37 = vpack.c.bf16 (!%p524_p9), %v928_v35, %v927_v34  ;;  %v929_v38 = vld [vmem:[%s6250_s4 + $0x30] sm:$0xff] (!%p524_p9)  ;;  %v930_v39 = vld [vmem:[%s6250_s4 + $0x38] sm:$0xff] (!%p524_p9)  ;;  %v931_v40 = vld [vmem:[%s6250_s4 + $0x40] sm:$0xff] (!%p524_p9)  ;;  %s6296_s27 = sld [smem:[#allocation16_spill]] (!%p524_p9)  ;;  %s4580_s23 = sshll.u32 (!%p524_p9), %s5497_s0, 7 }
  0x1e   : > { %v932_v41 = vld [vmem:[%s6250_s4 + $0x48] sm:$0xff] (!%p524_p9)  ;;  %v5129_v42 = vpack.c.bf16 (!%p524_p9), %v930_v39, %v929_v38  ;;  %v935_v43 = vld [vmem:[%s6250_s4 + $0x60] sm:$0xff] (!%p524_p9)  ;;  %v933_v46 = vld [vmem:[%s6250_s4 + $0x50] sm:$0xff] (!%p524_p9)  ;;  %s6298_s1 = sld [smem:[#allocation18_spill]] (!%p524_p9) }
  0x1f   : > { %v936_v44 = vld [vmem:[%s6250_s4 + $0x68] sm:$0xff] (!%p524_p9)  ;;  %v5132_v45 = vpack.c.bf16 (!%p524_p9), %v932_v41, %v931_v40  ;;  %v934_v47 = vld [vmem:[%s6250_s4 + $0x58] sm:$0xff] (!%p524_p9)  ;;  %v937_v50 = vld [vmem:[%s6250_s4 + $0x70] sm:$0xff] (!%p524_p9) }
  0x20   : > { %v591_v0 = vld [vmem:[%s6291_s26] sm:$0xff] (!%p524_p9)  ;;  %v592_v1 = vld [vmem:[%s6291_s26 + $0x8] sm:$0xff] (!%p524_p9)  ;;  %v593_v6 = vld [vmem:[%s6291_s26 + $0x10] sm:$0xff] (!%p524_p9)  ;;  %v5138_v48 = vpack.c.bf16 (!%p524_p9), %v936_v44, %v935_v43  ;;  %v5135_v49 = vpack.c.bf16 (!%p524_p9), %v934_v47, %v933_v46 }
  0x21   : > { %v595_v2 = vld [vmem:[%s6291_s26 + $0x20] sm:$0xff] (!%p524_p9)  ;;  %v5096_v4 = vpack.c.bf16 (!%p524_p9), %v592_v1, %v591_v0  ;;  %v596_v5 = vld [vmem:[%s6291_s26 + $0x28] sm:$0xff] (!%p524_p9)  ;;  %v594_v7 = vld [vmem:[%s6291_s26 + $0x18] sm:$0xff] (!%p524_p9) }
  0x22   : > { %v5102_v8 = vpack.c.bf16 %v596_v5, %v595_v2  ;;  %v597_v10 = vld [vmem:[%s6291_s26 + $0x30] sm:$0xff]  ;;  %v598_v11 = vld [vmem:[%s6291_s26 + $0x38] sm:$0xff]  ;;  %v5099_v12 = vpack.c.bf16 %v594_v7, %v593_v6  ;;  %s581_s24 = scalar_select %p580_p10, %s5497_s0, 1  ;;  %v599_v14 = vld [vmem:[%s6291_s26 + $0x40] sm:$0xff] }
  0x23   : > { %5097 = vmatpush3.bf16.msra.mxu0 %v5096_v4  ;;  %v5105_v13 = vpack.c.bf16 %v598_v11, %v597_v10  ;;  %v600_v15 = vld [vmem:[%s6291_s26 + $0x48] sm:$0xff]  ;;  %v603_v16 = vld [vmem:[%s6291_s26 + $0x60] sm:$0xff]  ;;  %v601_v23 = vld [vmem:[%s6291_s26 + $0x50] sm:$0xff]  ;;  %s5380_s0 = smov [#allocation2]  }
  0x24   : > { %5098 = vmatprep.subr.bf16.mxu0 %v5376_v3  ;;  %5103 = vmatpush3.bf16.msra.mxu1 %v5102_v8  ;;  %s4430_s21 = sshll.u32 %s581_s24, 3  ;;  %v604_v17 = vld [vmem:[%s6291_s26 + $0x68] sm:$0xff]  ;;  %v5108_v20 = vpack.c.bf16 %v600_v15, %v599_v14  ;;  %v602_v24 = vld [vmem:[%s6291_s26 + $0x58] sm:$0xff]  ;;  %v605_v25 = vld [vmem:[%s6291_s26 + $0x70] sm:$0xff] }
  0x25   : > { %5104 = vmatprep.subr.bf16.mxu1 %v5376_v3  ;;  %s583_s25 = scalar_lea.vmem %s6292_s17, %s4430_s21  ;;  %s587_s20 = scalar_lea.vmem %s6293_s2, %s4430_s21  ;;  %v5114_v22 = vpack.c.bf16 %v604_v17, %v603_v16  ;;  %v606_v26 = vld [vmem:[%s6291_s26 + $0x78] sm:$0xff]  ;;  %v5111_v27 = vpack.c.bf16 %v602_v24, %v601_v23  ;;  %v4432_v53 = vld [vmem:[%s6294_s3] ss:$0 sm:$0xff]  ;;  %v4433_v55 = vld [vmem:[%s6294_s3 + $0x1] ss:$0 sm:$0xff] }
  0x26   : > { %v5576_v18 = vld [vmem:[%s583_s25] sm:$0xff]  ;;  %v5117_v28 = vpack.c.bf16 %v606_v26, %v605_v25  ;;  %v938_v51 = vld [vmem:[%s6250_s4 + $0x78] sm:$0xff]  ;;  %s577_s25 = sand.u32 1, %s5366_s28  }
  0x27   : > { %5100 = vmatpush3.bf16.msra.mxu0 %v5099_v12  ;;  %v5578_v19 = vld [vmem:[%s587_s20] sm:$0xff]  ;;  %v5141_v52 = vpack.c.bf16 %v938_v51, %v937_v50  ;;  %s5379_s20 = smov 120   ;;  %s4429_s19 = sshll.u32 %s577_s25, 3 }
  0x28   : > { %v590_v21 = vadd.f32 %v5578_v19, %v5576_v18  ;;  %5106 = vmatpush3.bf16.msra.mxu1 %v5105_v13  ;;  %5107 = vmatprep.subr.bf16.mxu0 %v5376_v3  ;;  %v4434_v61 = vld [vmem:[%s6294_s3 + $0x2] ss:$0 sm:$0xff]  ;;  %v4435_v63 = vld [vmem:[%s6294_s3 + $0x3] ss:$0 sm:$0xff]  ;;  %v4440_v17 = vld [vmem:[%s6251_s5] ss:$0 sm:$0xff] }
  0x29   : > { %5113 = vmatprep.subr.bf16.mxu1 %v5376_v3  ;;  %v4441_v23 = vld [vmem:[%s6251_s5 + $0x1] ss:$0 sm:$0xff]  ;;  %s579_s24 = scalar_lea.vmem [#allocation2], %s4429_s19  ;;  %s4341_s17 = scalar_lea.sflag [#allocation3], %s577_s25 }
  0x2a   : > { %4748 = vmatmul.mubr.msk.f32.vlgmr.msra.gmra.mrb[0].mxu0 %vm635_vm1, %v590_v21  ;;  %s4354_s22 = sshll.u32 %s579_s24, 4  ;;  %s5316_s19 = sshll.u32 %s5380_s0, 4  ;;  %s6205_s22 = int_to_ptr.vmem [resolvable:$true] %s4354_s22  ;;  %s5317_s19 = int_to_ptr.vmem [resolvable:$false] %s5316_s19 }
  0x2b   : > { %5109 = vmatpush3.bf16.msra.mxu0 %v5108_v20  ;;  %4759 = vmatmul.mubr.msk.f32.vlgmr.msra.gmra.mrb[0].mxu1 %vm635_vm1, %v590_v21  ;;  %s5312_s16 = scalar_lea.vmem %s6205_s22, 128  ;;  %p5319_p0 = scmp.lt.s32.totalorder %s6205_s22, %s5317_s19 }
  0x2c   : > { %5110 = vmatprep.subr.bf16.mxu0 %v5376_v3  ;;  %5115 = vmatpush3.bf16.msra.mxu1 %v5114_v22  ;;  %p5313_p11 = scmp.ne.s32.totalorder %s6205_s22, %s5312_s16 }
  0x2d   : > { %4769 = vmatprep.mubr.msk.f32.mxu0 %vm5377_vm0, %v5378_v9  ;;  %5116 = vmatprep.subr.bf16.mxu1 %v5376_v3 }
  0x2e   : > { %4780 = vmatprep.mubr.msk.f32.mxu1 %vm5377_vm0, %v5378_v9  ;;  %p5314_p12 = pnand %p5313_p11, %p5514_p5 }
  0x2f   : > { %5112 = vmatpush3.bf16.msra.mxu0 %v5111_v27 }
  0x30   : > { %5118 = vmatpush3.bf16.msra.mxu1 %v5117_v28  ;;  %5119 = vmatprep.subr.bf16.mxu0 %v5376_v3  ;;  %p5315_p13 = pneg %p5314_p12 }
  0x31   : > { %5125 = vmatprep.subr.bf16.mxu1 %v5376_v3 }
  0x32   : > { %4770 = vmatmul.mubr.msk.f32.vlgmr.msra.gmra.mrb[2].mxu0 %vm635_vm1, %v590_v21 }
  0x33   : > { %4781 = vmatmul.mubr.msk.f32.vlgmr.msra.gmra.mrb[2].mxu1 %vm635_vm1, %v590_v21  ;;  %4791 = vmatprep.mubr.msk.f32.mxu0 %vm5377_vm0, %v5378_v9 }
  0x34   : > { %4802 = vmatprep.mubr.msk.f32.mxu1 %vm5377_vm0, %v5378_v9  ;;  %5121 = vmatpush3.bf16.msra.mxu0 %v5120_v32 }
  0x35   : > { %5122 = vmatprep.subr.bf16.mxu0 %v5376_v3  ;;  %5127 = vmatpush3.bf16.msra.mxu1 %v5126_v37 }
  0x36   : > { %5128 = vmatprep.subr.bf16.mxu1 %v5376_v3 }
  0x38   : > { %5124 = vmatpush3.bf16.msra.mxu0 %v5123_v36 }
  0x39   : > { %5131 = vmatprep.subr.bf16.mxu0 %v5376_v3  ;;  %5130 = vmatpush3.bf16.msra.mxu1 %v5129_v42 }
  0x3a   : > { %5137 = vmatprep.subr.bf16.mxu1 %v5376_v3 }
  0x3b   : > { %4792 = vmatmul.mubr.msk.f32.vlgmr.msra.gmra.mrb[4].mxu0 %vm635_vm1, %v5576_v18 }
  0x3c   : > { %5133 = vmatpush3.bf16.msra.mxu0 %v5132_v45  ;;  %4813 = vmatprep.mubr.msk.f32.mxu0 %vm5377_vm0, %v5378_v9 }
  0x3d   : > { %5134 = vmatprep.subr.bf16.mxu0 %v5376_v3  ;;  %4803 = vmatmul.mubr.msk.f32.vlgmr.msra.gmra.mrb[4].mxu1 %vm635_vm1, %v5576_v18 }
  0x3e   : > { %5139 = vmatpush3.bf16.msra.mxu1 %v5138_v48  ;;  %4824 = vmatprep.mubr.msk.f32.mxu1 %vm5377_vm0, %v5378_v9 }
  0x3f   : > { %5140 = vmatprep.subr.bf16.mxu1 %v5376_v3 }
  0x40   : > { %5136 = vmatpush3.bf16.msra.mxu0 %v5135_v49 }
  0x41   : > { %4827 = vmatprep.subr.mxu0 %v5378_v9 }
  0x42   : > { %5142 = vmatpush3.bf16.msra.mxu1 %v5141_v52 }
  0x43   : > { %4814 = vmatmul.mubr.msk.f32.vlgmr.msra.gmra.mrb[6].mxu0 %vm635_vm1, %v5576_v18  ;;  %4842 = vmatprep.subr.mxu1 %v5378_v9 }
  0x44   : > { %4829 = vmatprep.mubr.msk.f32.mxu0 %vm5377_vm0, %v5378_v9 }
  0x45   : > { %4825 = vmatmul.mubr.msk.f32.vlgmr.msra.gmra.mrb[6].mxu1 %vm635_vm1, %v5576_v18 }
  0x46   : > { %4844 = vmatprep.mubr.msk.f32.mxu1 %vm5377_vm0, %v5378_v9 }
  0xfd   : > { %v705_v54 = vpop.f32.mrb[0].mxu0 }
  0xfe   : > { %v706_v56 = vadd.f32 %v4432_v53, %v705_v54  ;;  %v4749_v57 = vpop.f32.mrb[1].mxu0  ;;  %v775_v58 = vpop.f32.mrb[0].mxu1 }
  0xff   : > { %v4760_v59 = vpop.f32.mrb[1].mxu1  ;;  %v776_v60 = vadd.f32 %v4433_v55, %v775_v58 }
 0x100   : > { %1251 = vrot.lane.b32.xlu0 %v706_v56, %s5379_s20  ;;  %v919_v14 = vmul.f32 0.35355338, %v706_v56 }
 0x101   : > { %v920_v16 = vmul.f32 0.35355338, %v776_v60 }
 0x104   : > { %1330 = vrot.lane.b32.xlu0 %v776_v60, %s5379_s20 }
 0x105   : > { %v845_v62 = vpop.f32.mrb[2].mxu0 }
 0x106   : > { %v846_v0 = vadd.f32 %v4434_v61, %v845_v62  ;;  %v4771_v1 = vpop.f32.mrb[3].mxu0  ;;  %v915_v2 = vpop.f32.mrb[2].mxu1 }
 0x107   : > { %v4782_v4 = vpop.f32.mrb[3].mxu1  ;;  %v916_v5 = vadd.f32 %v4435_v63, %v915_v2 }
 0x108   : > { %1408 = vrot.lane.b32.xlu1 %v846_v0, %s5379_s20  ;;  %v921_v22 = vmul.f32 0.35355338, %v846_v0  ;;  %v4442_v0 = vld [vmem:[%s6251_s5 + $0x2] ss:$0 sm:$0xff] }
 0x109   : > { %v922_v26 = vmul.f32 0.35355338, %v916_v5 }
 0x10c   : > { %1486 = vrot.lane.b32.xlu1 %v916_v5, %s5379_s20 }
 0x10e   : > { %v1036_v6 = vpop.f32.mrb[4].mxu0 }
 0x10f   : > { %v4793_v7 = vpop.f32.mrb[5].mxu0  ;;  %v1037_v21 = vadd.f32 %v4440_v17, %v1036_v6  ;;  %v4443_v6 = vld [vmem:[%s6251_s5 + $0x3] ss:$0 sm:$0xff]  ;;  %v1901_v17 = vld [vmem:[%s6252_s6 + $0x10] sm:$0xff] }
 0x110   : > { %v1106_v8 = vpop.f32.mrb[4].mxu1 }
 0x111   : > { %v4804_v10 = vpop.f32.mrb[5].mxu1  ;;  %v1107_v25 = vadd.f32 %v4441_v23, %v1106_v8 }
 0x116   : > { %v5700_v11 = vpop.f32.mrb[6].mxu0 }
 0x117   : > { %v4815_v13 = vpop.f32.mrb[7].mxu0  ;;  %v1177_v5 = vadd.f32 %v4442_v0, %v5700_v11  ;;  %v2330_v0 = vld [vmem:[%s6258_s12 + $0x20] sm:$0xff] }
 0x118   : > { %v5730_v27 = vpop.f32.mrb[6].mxu1 }
 0x119   : > { %v4826_v28 = vpop.f32.mrb[7].mxu1  ;;  %v1247_v10 = vadd.f32 %v4443_v6, %v5730_v27 }
 0x172   : > { %v1252_v12 = vpop.permute.xlu0 %1251 }
 0x173   : > { %4828 = vmatpush3.xpose.msk.msra.mxu0 %vm1253_vm2, %v1252_v12 }
 0x174   : > { %4832 = vmatprep.subr.mxu0 %v5378_v9 }
 0x176   : > { %v1331_v15 = vpop.permute.xlu0 %1330  ;;  %4830 = vmatmul.mubr.msk.f32.vlgmr.msra.gmra.mrb[8].mxu0 %vm1253_vm2, %v919_v14 }
 0x177   : > { %4833 = vmatpush3.xpose.msk.msra.mxu0 %vm1253_vm2, %v1331_v15  ;;  %4834 = vmatprep.mubr.msk.f32.mxu0 %vm5377_vm0, %v5378_v9  ;;  %v1899_v15 = vld [vmem:[%s6252_s6] sm:$0xff] }
 0x178   : > { %4837 = vmatprep.subr.mxu0 %v5378_v9 }
 0x17a   : > { %4835 = vmatmul.mubr.msk.f32.vlgmr.msra.gmra.mrb[10].mxu0 %vm1253_vm2, %v920_v16  ;;  %v1409_v20 = vpop.permute.xlu1 %1408  ;;  %v1900_v16 = vld [vmem:[%s6252_s6 + $0x8] sm:$0xff] }
 0x17b   : > { %4838 = vmatpush3.xpose.msk.msra.mxu0 %vm1253_vm2, %v1409_v20  ;;  %4839 = vmatprep.mubr.msk.f32.mxu0 %vm5377_vm0, %v5378_v9 }
 0x17c   : > { %4847 = vmatprep.subr.mxu0 %v5378_v9 }
 0x17e   : > { %v1487_v24 = vpop.permute.xlu1 %1486  ;;  %4840 = vmatmul.mubr.msk.f32.vlgmr.msra.gmra.mrb[12].mxu0 %vm1253_vm2, %v921_v22  ;;  %v1902_v22 = vld [vmem:[%s6252_s6 + $0x18] sm:$0xff] }
 0x17f   : > { %4843 = vmatpush3.xpose.msk.msra.mxu1 %vm1253_vm2, %v1487_v24  ;;  %4848 = vmatpush3.msra.mxu0 %v1037_v21 }
 0x180   : > { %4852 = vmatprep.subr.mxu1 %v5378_v9  ;;  %4849 = vmatprep.mubr.msk.f32.mxu0 %vm5377_vm0, %v5378_v9 }
 0x181   : > { %4857 = vmatprep.subr.mxu0 %v5378_v9 }
 0x182   : > { %4845 = vmatmul.mubr.msk.f32.vlgmr.msra.gmra.mrb[8].mxu1 %vm1253_vm2, %v922_v26 }
 0x183   : > { %4853 = vmatpush3.msra.mxu1 %v1107_v25  ;;  %4854 = vmatprep.mubr.msk.f32.mxu1 %vm5377_vm0, %v5378_v9 }
 0x184   : > { %4862 = vmatprep.subr.mxu1 %v5378_v9 }
 0x249   : > { %v1325_v29 = vpop.f32.mrb[8].mxu0 }
 0x24a   : > { %v4831_v30 = vpop.f32.mrb[9].mxu0  ;;  %v1563_v31 = vsel %vm1253_vm2, %v1325_v29, -inf }
 0x24b   : > { %1564 = vmax.xlane.f32.xlu0 %v1563_v31 }
 0x24d   : > { %v1403_v32 = vpop.f32.mrb[10].mxu0 }
 0x24e   : > { %v4836_v33 = vpop.f32.mrb[11].mxu0  ;;  %v1566_v34 = vsel %vm1253_vm2, %v1403_v32, -inf }
 0x24f   : > { %1567 = vmax.xlane.f32.xlu1 %v1566_v34 }
 0x251   : > { %v1481_v35 = vpop.f32.mrb[12].mxu0 }
 0x252   : > { %v4841_v36 = vpop.f32.mrb[13].mxu0  ;;  %v1569_v37 = vsel %vm1253_vm2, %v1481_v35, -inf }
 0x253   : > { %1570 = vmax.xlane.f32.xlu0 %v1569_v37 }
 0x255   : > { %v1559_v38 = vpop.f32.mrb[8].mxu1 }
 0x256   : > { %v4846_v39 = vpop.f32.mrb[9].mxu1  ;;  %v1572_v40 = vsel %vm1253_vm2, %v1559_v38, -inf }
 0x257   : > { %1573 = vmax.xlane.f32.xlu0 %v1572_v40 }
 0x2d8   : > { %v1565_v41 = vpop.xlane.xlu0 %1564 }
 0x2d9   : > { %v1575_v42 = vsub.f32 %v1325_v29, %v1565_v41 }
 0x2db   : > { %v1579_v43 = vmul.f32 1.442695, %v1575_v42  ;;  %v4464_v42 = vld [vmem:[%s6253_s7] ss:$0 sm:$0xff] }
 0x2dc   : > { %v1568_v44 = vpop.xlane.xlu1 %1567 }
 0x2dd   : > { %5270 = vpow2.f32 %v1579_v43  ;;  %v1576_v45 = vsub.f32 %v1403_v32, %v1568_v44 }
 0x2df   : > { %v1581_v46 = vmul.f32 1.442695, %v1576_v45 }
 0x2e0   : > { %v1571_v47 = vpop.xlane.xlu0 %1570 }
 0x2e1   : > { %5272 = vpow2.f32 %v1581_v46  ;;  %v1577_v48 = vsub.f32 %v1481_v35, %v1571_v47 }
 0x2e3   : > { %v1583_v49 = vmul.f32 1.442695, %v1577_v48 }
 0x2e4   : > { %v1574_v50 = vpop.xlane.xlu0 %1573 }
 0x2e5   : > { %5274 = vpow2.f32 %v1583_v49  ;;  %v1578_v51 = vsub.f32 %v1559_v38, %v1574_v50 }
 0x2e7   : > { %v5271_v52 = vpop.eup %5270  ;;  %v1585_v53 = vmul.f32 1.442695, %v1578_v51 }
 0x2e8   : > { %v1587_v54 = vsel %vm1253_vm2, %v5271_v52, 0.0 }
 0x2e9   : > { %5276 = vpow2.f32 %v1585_v53  ;;  %1588 = vadd.xlane.f32.xlu1 %v1587_v54  ;;  %v2241_v53 = vld [vmem:[%s6256_s10] sm:$0xff]  ;;  %v2242_v54 = vld [vmem:[%s6256_s10 + $0x8] sm:$0xff] }
 0x2eb   : > { %v5273_v55 = vpop.eup %5272 }
 0x2ec   : > { %v1590_v56 = vsel %vm1253_vm2, %v5273_v55, 0.0 }
 0x2ed   : > { %1591 = vadd.xlane.f32.xlu0 %v1590_v56  ;;  %v2244_v56 = vld [vmem:[%s6256_s10 + $0x18] sm:$0xff] }
 0x2ef   : > { %v5275_v57 = vpop.eup %5274 }
 0x2f0   : > { %v1593_v58 = vsel %vm1253_vm2, %v5275_v57, 0.0 }
 0x2f1   : > { %1594 = vadd.xlane.f32.xlu1 %v1593_v58  ;;  %v2326_v58 = vld [vmem:[%s6258_s12] sm:$0xff] }
 0x2f3   : > { %v5277_v59 = vpop.eup %5276 }
 0x2f4   : > { %v1596_v60 = vsel %vm1253_vm2, %v5277_v59, 0.0 }
 0x2f5   : > { %1597 = vadd.xlane.f32.xlu0 %v1596_v60  ;;  %v2328_v60 = vld [vmem:[%s6258_s12 + $0x10] sm:$0xff] }
 0x376   : > { %v1589_v61 = vpop.xlane.xlu1 %1588 }
 0x377   : > { %5278 = vrcp.f32 %v1589_v61 }
 0x37a   : > { %v1592_v62 = vpop.xlane.xlu0 %1591 }
 0x37b   : > { %5280 = vrcp.f32 %v1592_v62  ;;  %v2329_v62 = vld [vmem:[%s6258_s12 + $0x18] sm:$0xff] }
 0x37e   : > { %v1595_v63 = vpop.xlane.xlu1 %1594 }
 0x37f   : > { %5282 = vrcp.f32 %v1595_v63  ;;  %v5153_v63 = vpack.c.bf16 %v2329_v62, %v2328_v60 }
 0x381   : > { %v5279_v1 = vpop.eup %5278 }
 0x382   : > { %v1600_v2 = vmul.f32 %v5279_v1, %v5271_v52  ;;  %v1598_v4 = vpop.xlane.xlu0 %1597  ;;  %v2331_v1 = vld [vmem:[%s6258_s12 + $0x28] sm:$0xff] }
 0x383   : > { %5284 = vrcp.f32 %v1598_v4 }
 0x384   : > { %4850 = vmatmul.mubr.msk.f32.vlgmr.msra.gmra.mrb[14].mxu0 %vm1253_vm2, %v1600_v2  ;;  %v5156_v2 = vpack.c.bf16 %v2331_v1, %v2330_v0  ;;  %v4503_v0 = vld [vmem:[%s6250_s4 + $0x90] sm:$0xff]  ;;  %v4504_v1 = vld [vmem:[%s6250_s4 + $0x98] sm:$0xff] }
 0x385   : > { %v5281_v7 = vpop.eup %5280  ;;  %4858 = vmatpush3.msra.mxu0 %v1177_v5  ;;  %4859 = vmatprep.mubr.msk.f32.mxu0 %vm5377_vm0, %v5378_v9 }
 0x386   : > { %v1602_v8 = vmul.f32 %v5281_v7, %v5273_v55  ;;  %4867 = vmatprep.subr.mxu0 %v5378_v9  ;;  %v5144_v55 = vpack.c.bf16 %v2242_v54, %v2241_v53  ;;  %v4472_v53 = vld [vmem:[%s6261_s15] ss:$0 sm:$0xff] }
 0x387   : > { %v4477_v54 = vld [vmem:[%s6291_s26 + $0xa0] sm:$0xff] }
 0x388   : > { %4855 = vmatmul.mubr.msk.f32.vlgmr.msra.gmra.mrb[10].mxu1 %vm1253_vm2, %v1602_v8  ;;  %v4465_v8 = vld [vmem:[%s6254_s8] ss:$0 sm:$0xff] }
 0x389   : > { %v5283_v11 = vpop.eup %5282  ;;  %4863 = vmatpush3.msra.mxu1 %v1247_v10  ;;  %4864 = vmatprep.mubr.msk.f32.mxu1 %vm5377_vm0, %v5378_v9 }
 0x38a   : > { %v1604_v12 = vmul.f32 %v5283_v11, %v5275_v57  ;;  %4872 = vmatprep.subr.mxu1 %v5378_v9  ;;  %v4466_v11 = vld [vmem:[%s6255_s9] ss:$0 sm:$0xff] }
 0x38c   : > { %4860 = vmatmul.mubr.msk.f32.vlgmr.msra.gmra.mrb[16].mxu0 %vm1253_vm2, %v1604_v12 }
 0x38d   : > { %v5285_v13 = vpop.eup %5284  ;;  %4869 = vmatprep.mubr.msk.f32.mxu0 %vm5377_vm0, %v5378_v9  ;;  %4868 = vmatpush3.msra.mxu0 %v1899_v15  ;;  %v2333_v15 = vld [vmem:[%s6258_s12 + $0x38] sm:$0xff] }
 0x38e   : > { %v1606_v14 = vmul.f32 %v5285_v13, %v5277_v59  ;;  %4877 = vmatprep.subr.mxu0 %v5378_v9  ;;  %v2327_v59 = vld [vmem:[%s6258_s12 + $0x8] sm:$0xff] }
 0x38f   : > { %v5150_v61 = vpack.c.bf16 %v2327_v59, %v2326_v58 }
 0x390   : > { %4865 = vmatmul.mubr.msk.f32.vlgmr.msra.gmra.mrb[12].mxu1 %vm1253_vm2, %v1606_v14  ;;  %v2332_v14 = vld [vmem:[%s6258_s12 + $0x30] sm:$0xff] }
 0x391   : > { %4874 = vmatprep.mubr.msk.f32.mxu1 %vm5377_vm0, %v5378_v9  ;;  %4873 = vmatpush3.msra.mxu1 %v1900_v16  ;;  %v5159_v16 = vpack.c.bf16 %v2333_v15, %v2332_v14  ;;  %v4512_v14 = vld [vmem:[%s6250_s4 + $0xd8] sm:$0xff] }
 0x392   : > { %4882 = vmatprep.subr.mxu1 %v5378_v9 }
 0x457   : > { %v1676_v20 = vpop.f32.mrb[14].mxu0 }
 0x458   : > { %v4851_v21 = vpop.f32.mrb[15].mxu0  ;;  %4870 = vmatmul.mubr.msk.f32.vlgmr.msra.gmra.mrb[18].mxu0 %vm1253_vm2, %v1676_v20 }
 0x459   : > { %4878 = vmatpush3.msra.mxu0 %v1901_v17  ;;  %4879 = vmatprep.mubr.msk.f32.mxu0 %vm5377_vm0, %v5378_v9  ;;  %v4467_v17 = vld [vmem:[%s6257_s11] ss:$0 sm:$0xff] }
 0x45a   : > { %5143 = vmatprep.subr.bf16.mxu0 %v5376_v3 }
 0x45b   : > { %v1749_v23 = vpop.f32.mrb[10].mxu1 }
 0x45c   : > { %v4856_v24 = vpop.f32.mrb[11].mxu1  ;;  %4875 = vmatmul.mubr.msk.f32.vlgmr.msra.gmra.mrb[14].mxu1 %vm1253_vm2, %v1749_v23 }
 0x45d   : > { %4883 = vmatpush3.msra.mxu1 %v1902_v22  ;;  %4884 = vmatprep.mubr.msk.f32.mxu1 %vm5377_vm0, %v5378_v9  ;;  %v4469_v24 = vld [vmem:[%s6259_s13] ss:$0 sm:$0xff] }
 0x45e   : > { %5149 = vmatprep.subr.bf16.mxu1 %v5376_v3 }
 0x45f   : > { %v1822_v25 = vpop.f32.mrb[16].mxu0 }
 0x460   : > { %v4861_v26 = vpop.f32.mrb[17].mxu0  ;;  %4880 = vmatmul.mubr.msk.f32.vlgmr.msra.gmra.mrb[20].mxu0 %vm1253_vm2, %v1822_v25 }
 0x461   : > { %4895 = vmatprep.mubr.msk.f32.mxu0 %vm5377_vm0, %v5378_v9  ;;  %5145 = vmatpush3.bf16.msra.mxu0 %v5144_v55 }
 0x462   : > { %5146 = vmatprep.subr.bf16.mxu0 %v5376_v3 }
 0x463   : > { %v1895_v27 = vpop.f32.mrb[12].mxu1 }
 0x464   : > { %v4866_v28 = vpop.f32.mrb[13].mxu1  ;;  %4885 = vmatmul.mubr.msk.f32.vlgmr.msra.gmra.mrb[16].mxu1 %vm1253_vm2, %v1895_v27 }
 0x465   : > { %4914 = vmatprep.mubr.msk.f32.mxu1 %vm5377_vm0, %v5378_v9  ;;  %5151 = vmatpush3.bf16.msra.mxu1 %v5150_v61  ;;  %v4479_v61 = vld [vmem:[%s6291_s26 + $0xb0] sm:$0xff] }
 0x466   : > { %5152 = vmatprep.subr.bf16.mxu1 %v5376_v3 }
 0x469   : > { %5154 = vmatpush3.bf16.msra.mxu1 %v5153_v63  ;;  %v4480_v63 = vld [vmem:[%s6291_s26 + $0xb8] sm:$0xff] }
 0x46a   : > { %5155 = vmatprep.subr.bf16.mxu1 %v5376_v3 }
 0x46d   : > { %5157 = vmatpush3.bf16.msra.mxu1 %v5156_v2  ;;  %v5171_v2 = vpack.c.bf16 %v4480_v63, %v4479_v61  ;;  %v4522_v63 = vld [vmem:[%s6251_s5 + $0x5] ss:$0 sm:$0xff] }
 0x46e   : > { %5158 = vmatprep.subr.bf16.mxu1 %v5376_v3 }
 0x471   : > { %5160 = vmatpush3.bf16.msra.mxu1 %v5159_v16 }
 0x472   : > { %5173 = vmatprep.subr.bf16.mxu1 %v5376_v3 }
 0x52b   : > { %v1972_v29 = vpop.f32.mrb[18].mxu0 }
 0x52c   : > { %v4871_v30 = vpop.f32.mrb[19].mxu0  ;;  %v2195_v32 = vsel %vm635_vm1, %v1972_v29, 0.0 }
 0x52f   : > { %v2045_v31 = vpop.f32.mrb[14].mxu1 }
 0x530   : > { %v2196_v33 = vsel %vm635_vm1, %v2045_v31, 0.0  ;;  %v4876_v34 = vpop.f32.mrb[15].mxu1 }
 0x531   : > { %v2197_v35 = vadd.f32 %v2196_v33, %v2195_v32 }
 0x533   : > { %v2118_v36 = vpop.f32.mrb[20].mxu0 }
 0x534   : > { %v2198_v37 = vsel %vm635_vm1, %v2118_v36, 0.0  ;;  %v4881_v38 = vpop.f32.mrb[21].mxu0  ;;  %v4474_v36 = vld [vmem:[%s6291_s26 + $0x88] sm:$0xff] }
 0x535   : > { %v2199_v39 = vadd.f32 %v2198_v37, %v2197_v35  ;;  %v4473_v35 = vld [vmem:[%s6291_s26 + $0x80] sm:$0xff] }
 0x536   : > { %v4481_v37 = vld [vmem:[%s6291_s26 + $0xc0] sm:$0xff]  ;;  %v5162_v38 = vpack.c.bf16 %v4474_v36, %v4473_v35 }
 0x537   : > { %v2191_v40 = vpop.f32.mrb[16].mxu1 }
 0x538   : > { %v2200_v41 = vsel %vm635_vm1, %v2191_v40, 0.0  ;;  %v4886_v43 = vpop.f32.mrb[17].mxu1 }
 0x539   : > { %v2201_v44 = vadd.f32 %v2200_v41, %v2199_v39  ;;  %v4482_v39 = vld [vmem:[%s6291_s26 + $0xc8] sm:$0xff]  ;;  %v4475_v41 = vld [vmem:[%s6291_s26 + $0x90] sm:$0xff] }
 0x53a   : > { %v5174_v40 = vpack.c.bf16 %v4482_v39, %v4481_v37  ;;  %v4483_v43 = vld [vmem:[%s6291_s26 + $0xd0] sm:$0xff]  ;;  %v4495_v37 = vld [vmem:[%s6294_s3 + $0x6] ss:$0 sm:$0xff]  ;;  %v4494_v39 = vld [vmem:[%s6294_s3 + $0x5] ss:$0 sm:$0xff] }
 0x53b   : > { %v2209_v45 = vadd.f32 %v4464_v42, %v2201_v44  ;;  %v4476_v42 = vld [vmem:[%s6291_s26 + $0x98] sm:$0xff] }
 0x53c   : > { %v5165_v44 = vpack.c.bf16 %v4476_v42, %v4475_v41 }
 0x53d   : > { %v2210_v46 = vadd.f32 %v2209_v45, %v5576_v18  ;;  %v2243_v18 = vld [vmem:[%s6256_s10 + $0x10] sm:$0xff]  ;;  %v4484_v45 = vld [vmem:[%s6291_s26 + $0xd8] sm:$0xff] }
 0x53e   : > { %v5147_v57 = vpack.c.bf16 %v2244_v56, %v2243_v18  ;;  %v4478_v18 = vld [vmem:[%s6291_s26 + $0xa8] sm:$0xff]  ;;  %v4501_v56 = vld [vmem:[%s6250_s4 + $0x80] sm:$0xff] }
 0x53f   : > { %v2213_v47 = vsel %vm635_vm1, %v2210_v46, 0.0  ;;  %v5168_v59 = vpack.c.bf16 %v4478_v18, %v4477_v54 }
 0x540   : > { %2214 = vadd.xlane.f32.xlu1 %v2213_v47  ;;  %5148 = vmatpush3.bf16.msra.mxu0 %v5147_v57  ;;  %v4502_v57 = vld [vmem:[%s6250_s4 + $0x88] sm:$0xff] }
 0x541   : > { %5161 = vmatprep.subr.bf16.mxu0 %v5376_v3  ;;  %v5186_v60 = vpack.c.bf16 %v4502_v57, %v4501_v56  ;;  %v4521_v56 = vld [vmem:[%s6251_s5 + $0x4] ss:$0 sm:$0xff] }
 0x5cd   : > { %v2215_v48 = vpop.xlane.xlu1 %2214 }
 0x5ce   : > { %v2217_v49 = vmul.f32 0.03125, %v2215_v48 }
 0x5d0   : > { %v2218_v50 = vsub.f32 %v2210_v46, %v2217_v49  ;;  %v5177_v46 = vpack.c.bf16 %v4484_v45, %v4483_v43  ;;  %v4496_v45 = vld [vmem:[%s6294_s3 + $0x7] ss:$0 sm:$0xff] }
 0x5d2   : > { %v2219_v51 = vmul.f32 %v2218_v50, %v2218_v50 }
 0x5d4   : > { %v2220_v52 = vsel %vm635_vm1, %v2219_v51, 0.0  ;;  %v4471_v51 = vld [vmem:[%s6260_s14] ss:$0 sm:$0xff] }
 0x5d5   : > { %2221 = vadd.xlane.f32.xlu0 %v2220_v52 }
 0x662   : > { %v2222_v4 = vpop.xlane.xlu0 %2221 }
 0x663   : > { %v2223_v5 = vmul.f32 0.03125, %v2222_v4  ;;  %v4485_v4 = vld [vmem:[%s6291_s26 + $0xe0] sm:$0xff] }
 0x665   : > { %v2224_v6 = vadd.f32 1e-05, %v2223_v5  ;;  %v4486_v5 = vld [vmem:[%s6291_s26 + $0xe8] sm:$0xff] }
 0x667   : > { %5286 = vrsqrt.f32 %v2224_v6  ;;  %v4509_v6 = vld [vmem:[%s6250_s4 + $0xc0] sm:$0xff] }
 0x671   : > { %v5287_v7 = vpop.eup %5286 }
 0x672   : > { %v2226_v10 = vmul.f32 %v5287_v7, %v2218_v50  ;;  %v4510_v7 = vld [vmem:[%s6250_s4 + $0xc8] sm:$0xff] }
 0x674   : > { %v2233_v12 = vmul.f32 %v4465_v8, %v2226_v10  ;;  %v5180_v8 = vpack.c.bf16 %v4486_v5, %v4485_v4  ;;  %v5198_v10 = vpack.c.bf16 %v4510_v7, %v4509_v6 }
 0x676   : > { %v2240_v13 = vadd.f32 %v4466_v11, %v2233_v12  ;;  %v4487_v11 = vld [vmem:[%s6291_s26 + $0xf0] sm:$0xff]  ;;  %v4488_v12 = vld [vmem:[%s6291_s26 + $0xf8] sm:$0xff] }
 0x677   : > { %v5183_v15 = vpack.c.bf16 %v4488_v12, %v4487_v11 }
 0x678   : > { %4896 = vmatmul.mubr.msk.f32.vlgmr.msra.gmra.mrb[22].mxu0 %vm635_vm1, %v2240_v13 }
 0x679   : > { %4925 = vmatprep.mubr.msk.f32.mxu0 %vm5377_vm0, %v5378_v9  ;;  %5163 = vmatpush3.bf16.msra.mxu0 %v5162_v38 }
 0x67a   : > { %5164 = vmatprep.subr.bf16.mxu0 %v5376_v3 }
 0x67d   : > { %5166 = vmatpush3.bf16.msra.mxu0 %v5165_v44 }
 0x67e   : > { %5167 = vmatprep.subr.bf16.mxu0 %v5376_v3 }
 0x74b   : > { %v2321_v20 = vpop.f32.mrb[22].mxu0 }
 0x74c   : > { %v2322_v21 = vadd.f32 %v4467_v17, %v2321_v20  ;;  %v4897_v22 = vpop.f32.mrb[23].mxu0  ;;  %v4505_v17 = vld [vmem:[%s6250_s4 + $0xa0] sm:$0xff]  ;;  %v4506_v20 = vld [vmem:[%s6250_s4 + $0xa8] sm:$0xff] }
 0x74d   : > { %v4507_v22 = vld [vmem:[%s6250_s4 + $0xb0] sm:$0xff] }
 0x74e   : > { %v2325_v23 = vmax.f32 %v2322_v21, 0.0  ;;  %v5192_v21 = vpack.c.bf16 %v4506_v20, %v4505_v17 }
 0x750   : > { %4915 = vmatmul.mubr.msk.f32.vlgmr.msra.gmra.mrb[18].mxu1 %vm2341_vm3, %v2325_v23  ;;  %v4508_v23 = vld [vmem:[%s6250_s4 + $0xb8] sm:$0xff] }
 0x751   : > { %4947 = vmatprep.mubr.msk.f32.mxu1 %vm5377_vm0, %v5378_v9  ;;  %5175 = vmatpush3.bf16.msra.mxu1 %v5174_v40 }
 0x752   : > { %5176 = vmatprep.subr.bf16.mxu1 %v5376_v3 }
 0x755   : > { %5178 = vmatpush3.bf16.msra.mxu1 %v5177_v46 }
 0x756   : > { %5185 = vmatprep.subr.bf16.mxu1 %v5376_v3 }
 0x823   : > { %v2411_v25 = vpop.f32.mrb[18].mxu1 }
 0x824   : > { %v2412_v26 = vadd.f32 %v4469_v24, %v2411_v25  ;;  %v4916_v27 = vpop.f32.mrb[19].mxu1  ;;  %v5195_v24 = vpack.c.bf16 %v4508_v23, %v4507_v22  ;;  %v4513_v25 = vld [vmem:[%s6250_s4 + $0xe0] sm:$0xff] }
 0x826   : > { %v2415_v28 = vadd.f32 %v2412_v26, %v2240_v13  ;;  %v4511_v13 = vld [vmem:[%s6250_s4 + $0xd0] sm:$0xff]  ;;  %v4514_v26 = vld [vmem:[%s6250_s4 + $0xe8] sm:$0xff] }
 0x827   : > { %v5201_v16 = vpack.c.bf16 %v4512_v14, %v4511_v13  ;;  %v5204_v27 = vpack.c.bf16 %v4514_v26, %v4513_v25 }
 0x828   : > { %v2418_v29 = vsel %vm635_vm1, %v2415_v28, 0.0 }
 0x829   : > { %2419 = vadd.xlane.f32.xlu1 %v2418_v29  ;;  %v4516_v29 = vld [vmem:[%s6250_s4 + $0xf8] sm:$0xff] }
 0x8b6   : > { %v2420_v30 = vpop.xlane.xlu1 %2419 }
 0x8b7   : > { %v2421_v31 = vmul.f32 0.03125, %v2420_v30 }
 0x8b9   : > { %v2422_v32 = vsub.f32 %v2415_v28, %v2421_v31  ;;  %v4515_v28 = vld [vmem:[%s6250_s4 + $0xf0] sm:$0xff]  ;;  %v4493_v31 = vld [vmem:[%s6294_s3 + $0x4] ss:$0 sm:$0xff]  ;;  %s6203_s3 = scalar_lea.hbm %s6298_s1, %s4580_s23 }
 0x8ba   : > { %v5207_v30 = vpack.c.bf16 %v4516_v29, %v4515_v28 }
 0x8bb   : > { %v2423_v33 = vmul.f32 %v2422_v32, %v2422_v32 }
 0x8bd   : > { %v2424_v34 = vsel %vm635_vm1, %v2423_v33, 0.0 }
 0x8be   : > { %2425 = vadd.xlane.f32.xlu0 %v2424_v34 }
 0x94b   : > { %v2426_v47 = vpop.xlane.xlu0 %2425 }
 0x94c   : > { %v2427_v48 = vmul.f32 0.03125, %v2426_v47 }
 0x94e   : > { %v2428_v49 = vadd.f32 1e-05, %v2427_v48 }
 0x950   : > { %5288 = vrsqrt.f32 %v2428_v49 }
 0x95a   : > { %v5289_v50 = vpop.eup %5288 }
 0x95b   : > { %v2430_v52 = vmul.f32 %v5289_v50, %v2422_v32 }
 0x95d   : > { %v2437_v55 = vmul.f32 %v4471_v51, %v2430_v52 }
 0x95f   : > { %v5908_v58 = vadd.f32 %v4472_v53, %v2437_v55 }
 0x961   : > { %v2445_v62 = vadd.f32 %v5908_v58, %v5578_v19  ;;  %v5189_v19 = vpack.c.bf16 %v4504_v1, %v4503_v0 }
 0x963   : > { %4926 = vmatmul.mubr.msk.f32.vlgmr.msra.gmra.mrb[24].mxu0 %vm635_vm1, %v2445_v62  ;;  %4948 = vmatmul.mubr.msk.f32.vlgmr.msra.gmra.mrb[20].mxu1 %vm635_vm1, %v2445_v62 }
 0x964   : > { %5169 = vmatpush3.bf16.msra.mxu0 %v5168_v59  ;;  %5187 = vmatpush3.bf16.msra.mxu1 %v5186_v60 }
 0x965   : > { %5170 = vmatprep.subr.bf16.mxu0 %v5376_v3  ;;  %5188 = vmatprep.subr.bf16.mxu1 %v5376_v3 }
 0x966   : > { %4936 = vmatprep.mubr.msk.f32.mxu0 %vm5377_vm0, %v5378_v9  ;;  %4969 = vmatprep.mubr.msk.f32.mxu1 %vm5377_vm0, %v5378_v9 }
 0x968   : > { %5172 = vmatpush3.bf16.msra.mxu0 %v5171_v2  ;;  %5190 = vmatpush3.bf16.msra.mxu1 %v5189_v19 }
 0x969   : > { %5179 = vmatprep.subr.bf16.mxu0 %v5376_v3  ;;  %5197 = vmatprep.subr.bf16.mxu1 %v5376_v3 }
 0x96b   : > { %4937 = vmatmul.mubr.msk.f32.vlgmr.msra.gmra.mrb[26].mxu0 %vm635_vm1, %v2445_v62  ;;  %4970 = vmatmul.mubr.msk.f32.vlgmr.msra.gmra.mrb[22].mxu1 %vm635_vm1, %v5908_v58 }
 0x96c   : > { %5181 = vmatpush3.bf16.msra.mxu0 %v5180_v8  ;;  %5199 = vmatpush3.bf16.msra.mxu1 %v5198_v10 }
 0x96d   : > { %5182 = vmatprep.subr.bf16.mxu0 %v5376_v3  ;;  %5200 = vmatprep.subr.bf16.mxu1 %v5376_v3 }
 0x96e   : > { %4958 = vmatprep.mubr.msk.f32.mxu0 %vm5377_vm0, %v5378_v9  ;;  %4991 = vmatprep.mubr.msk.f32.mxu1 %vm5377_vm0, %v5378_v9 }
 0x970   : > { %5184 = vmatpush3.bf16.msra.mxu0 %v5183_v15  ;;  %5202 = vmatpush3.bf16.msra.mxu1 %v5201_v16 }
 0x971   : > { %5191 = vmatprep.subr.bf16.mxu0 %v5376_v3  ;;  %5005 = vmatprep.subr.mxu1 %v5378_v9 }
 0x973   : > { %4959 = vmatmul.mubr.msk.f32.vlgmr.msra.gmra.mrb[28].mxu0 %vm635_vm1, %v2445_v62  ;;  %4992 = vmatmul.mubr.msk.f32.vlgmr.msra.gmra.mrb[24].mxu1 %vm635_vm1, %v5908_v58 }
 0x974   : > { %5193 = vmatpush3.bf16.msra.mxu0 %v5192_v21  ;;  %4980 = vmatprep.mubr.msk.f32.mxu0 %vm5377_vm0, %v5378_v9 }
 0x975   : > { %5194 = vmatprep.subr.bf16.mxu0 %v5376_v3  ;;  %5007 = vmatprep.mubr.msk.f32.mxu1 %vm5377_vm0, %v5378_v9 }
 0x978   : > { %5196 = vmatpush3.bf16.msra.mxu0 %v5195_v24 }
 0x979   : > { %5203 = vmatprep.subr.bf16.mxu0 %v5376_v3 }
 0x97b   : > { %4981 = vmatmul.mubr.msk.f32.vlgmr.msra.gmra.mrb[30].mxu0 %vm635_vm1, %v5908_v58 }
 0x97c   : > { %5205 = vmatpush3.bf16.msra.mxu0 %v5204_v27  ;;  %5002 = vmatprep.mubr.msk.f32.mxu0 %vm5377_vm0, %v5378_v9 }
 0x97d   : > { %5206 = vmatprep.subr.bf16.mxu0 %v5376_v3 }
 0x980   : > { %5208 = vmatpush3.bf16.msra.mxu0 %v5207_v30 }
 0x981   : > { %5015 = vmatprep.subr.mxu0 %v5378_v9 }
 0x983   : > { %5003 = vmatmul.mubr.msk.f32.vlgmr.msra.gmra.mrb[32].mxu0 %vm635_vm1, %v5908_v58 }
 0x984   : > { %5017 = vmatprep.mubr.msk.f32.mxu0 %vm5377_vm0, %v5378_v9 }
 0xa36   : > { %v2561_v32 = vpop.f32.mrb[24].mxu0  ;;  %v2701_v33 = vpop.f32.mrb[20].mxu1 }
 0xa37   : > { %v2562_v34 = vadd.f32 %v4493_v31, %v2561_v32  ;;  %v4927_v35 = vpop.f32.mrb[25].mxu0  ;;  %v4949_v36 = vpop.f32.mrb[21].mxu1  ;;  %v2702_v38 = vadd.f32 %v4495_v37, %v2701_v33 }
 0xa39   : > { %3109 = vrot.lane.b32.xlu1 %v2562_v34, %s5379_s20  ;;  %v2775_v18 = vmul.f32 0.35355338, %v2562_v34  ;;  %v2777_v59 = vmul.f32 0.35355338, %v2702_v38 }
 0xa3d   : > { %3265 = vrot.lane.b32.xlu1 %v2702_v38, %s5379_s20 }
 0xa3e   : > { %v2894_v40 = vpop.f32.mrb[22].mxu1  ;;  %v2631_v41 = vpop.f32.mrb[26].mxu0 }
 0xa3f   : > { %v2632_v42 = vadd.f32 %v4494_v39, %v2631_v41  ;;  %v4938_v43 = vpop.f32.mrb[27].mxu0  ;;  %v4971_v44 = vpop.f32.mrb[23].mxu1  ;;  %v2895_v60 = vadd.f32 %v4521_v56, %v2894_v40  ;;  %v4523_v41 = vld [vmem:[%s6251_s5 + $0x6] ss:$0 sm:$0xff] }
 0xa41   : > { %3187 = vrot.lane.b32.xlu0 %v2632_v42, %s5379_s20  ;;  %v2776_v62 = vmul.f32 0.35355338, %v2632_v42 }
 0xa46   : > { %v2771_v46 = vpop.f32.mrb[28].mxu0  ;;  %v6027_v47 = vpop.f32.mrb[24].mxu1 }
 0xa47   : > { %v2772_v48 = vadd.f32 %v4496_v45, %v2771_v46  ;;  %v4960_v49 = vpop.f32.mrb[29].mxu0  ;;  %v4993_v50 = vpop.f32.mrb[25].mxu1  ;;  %v3035_v44 = vadd.f32 %v4523_v41, %v6027_v47 }
 0xa48   : > { %v4524_v49 = vld [vmem:[%s6251_s5 + $0x7] ss:$0 sm:$0xff] }
 0xa49   : > { %3343 = vrot.lane.b32.xlu1 %v2772_v48, %s5379_s20  ;;  %v2778_v1 = vmul.f32 0.35355338, %v2772_v48  ;;  %s6297_s20 = sld [smem:[#allocation17_spill]] }
 0xa4e   : > { %v2964_v51 = vpop.f32.mrb[30].mxu0 }
 0xa4f   : > { %v4982_v52 = vpop.f32.mrb[31].mxu0  ;;  %v2965_v2 = vadd.f32 %v4522_v63, %v2964_v51 }
 0xa56   : > { %v6030_v53 = vpop.f32.mrb[32].mxu0 }
 0xa57   : > { %v5004_v54 = vpop.f32.mrb[33].mxu0  ;;  %v3105_v51 = vadd.f32 %v4524_v49, %v6030_v53  ;;  %v4542_v53 = vld [vmem:[%s6252_s6 + $0x28] sm:$0xff]  ;;  %v4554_v49 = vld [vmem:[%s6255_s9 + $0x1] ss:$0 sm:$0xff] }
 0xaab   : > { %v3110_v55 = vpop.permute.xlu1 %3109 }
 0xaac   : > { %5006 = vmatpush3.xpose.msk.msra.mxu1 %vm1253_vm2, %v3110_v55  ;;  %v4541_v55 = vld [vmem:[%s6252_s6 + $0x20] sm:$0xff] }
 0xaad   : > { %5010 = vmatprep.subr.mxu1 %v5378_v9 }
 0xaaf   : > { %v3266_v57 = vpop.permute.xlu1 %3265  ;;  %5008 = vmatmul.mubr.msk.f32.vlgmr.msra.gmra.mrb[26].mxu1 %vm1253_vm2, %v2775_v18  ;;  %v4543_v18 = vld [vmem:[%s6252_s6 + $0x30] sm:$0xff] }
 0xab0   : > { %5016 = vmatpush3.xpose.msk.msra.mxu0 %vm1253_vm2, %v3266_v57  ;;  %5012 = vmatprep.mubr.msk.f32.mxu1 %vm5377_vm0, %v5378_v9 }
 0xab1   : > { %5025 = vmatprep.subr.mxu0 %v5378_v9 }
 0xab3   : > { %v3188_v61 = vpop.permute.xlu0 %3187  ;;  %5018 = vmatmul.mubr.msk.f32.vlgmr.msra.gmra.mrb[34].mxu0 %vm1253_vm2, %v2777_v59 }
 0xab4   : > { %5011 = vmatpush3.xpose.msk.msra.mxu1 %vm1253_vm2, %v3188_v61  ;;  %5026 = vmatpush3.msra.mxu0 %v2895_v60  ;;  %v4544_v61 = vld [vmem:[%s6252_s6 + $0x38] sm:$0xff] }
 0xab5   : > { %5020 = vmatprep.subr.mxu1 %v5378_v9  ;;  %5027 = vmatprep.mubr.msk.f32.mxu0 %vm5377_vm0, %v5378_v9 }
 0xab6   : > { %5035 = vmatprep.subr.mxu0 %v5378_v9 }
 0xab7   : > { %5013 = vmatmul.mubr.msk.f32.vlgmr.msra.gmra.mrb[28].mxu1 %vm1253_vm2, %v2776_v62 }
 0xab8   : > { %5022 = vmatprep.mubr.msk.f32.mxu1 %vm5377_vm0, %v5378_v9 }
 0xabb   : > { %v3344_v0 = vpop.permute.xlu1 %3343 }
 0xabc   : > { %5021 = vmatpush3.xpose.msk.msra.mxu1 %vm1253_vm2, %v3344_v0 }
 0xabd   : > { %5030 = vmatprep.subr.mxu1 %v5378_v9 }
 0xabf   : > { %5023 = vmatmul.mubr.msk.f32.vlgmr.msra.gmra.mrb[30].mxu1 %vm1253_vm2, %v2778_v1 }
 0xac0   : > { %5031 = vmatpush3.msra.mxu1 %v2965_v2  ;;  %5032 = vmatprep.mubr.msk.f32.mxu1 %vm5377_vm0, %v5378_v9 }
 0xac1   : > { %5040 = vmatprep.subr.mxu1 %v5378_v9 }
 0xb82   : > { %v3182_v19 = vpop.f32.mrb[26].mxu1 }
 0xb83   : > { %v5009_v4 = vpop.f32.mrb[27].mxu1  ;;  %v3420_v5 = vsel %vm1253_vm2, %v3182_v19, -inf }
 0xb84   : > { %3421 = vmax.xlane.f32.xlu0 %v3420_v5 }
 0xb86   : > { %v3338_v6 = vpop.f32.mrb[34].mxu0 }
 0xb87   : > { %v5019_v7 = vpop.f32.mrb[35].mxu0  ;;  %v3426_v8 = vsel %vm1253_vm2, %v3338_v6, -inf }
 0xb88   : > { %3427 = vmax.xlane.f32.xlu0 %v3426_v8 }
 0xb8a   : > { %v3260_v10 = vpop.f32.mrb[28].mxu1 }
 0xb8b   : > { %v5014_v11 = vpop.f32.mrb[29].mxu1  ;;  %v3423_v12 = vsel %vm1253_vm2, %v3260_v10, -inf }
 0xb8c   : > { %3424 = vmax.xlane.f32.xlu1 %v3423_v12 }
 0xb92   : > { %v3416_v13 = vpop.f32.mrb[30].mxu1 }
 0xb93   : > { %v5024_v14 = vpop.f32.mrb[31].mxu1  ;;  %v3429_v15 = vsel %vm1253_vm2, %v3416_v13, -inf }
 0xb94   : > { %3430 = vmax.xlane.f32.xlu0 %v3429_v15 }
 0xc11   : > { %v3422_v16 = vpop.xlane.xlu0 %3421 }
 0xc12   : > { %v3432_v17 = vsub.f32 %v3182_v19, %v3422_v16 }
 0xc14   : > { %v3436_v20 = vmul.f32 1.442695, %v3432_v17 }
 0xc15   : > { %v3428_v21 = vpop.xlane.xlu0 %3427 }
 0xc16   : > { %5290 = vpow2.f32 %v3436_v20  ;;  %v3434_v22 = vsub.f32 %v3338_v6, %v3428_v21 }
 0xc18   : > { %v3440_v23 = vmul.f32 1.442695, %v3434_v22 }
 0xc19   : > { %v3425_v24 = vpop.xlane.xlu1 %3424 }
 0xc1a   : > { %5292 = vpow2.f32 %v3440_v23  ;;  %v3433_v25 = vsub.f32 %v3260_v10, %v3425_v24 }
 0xc1c   : > { %v3438_v26 = vmul.f32 1.442695, %v3433_v25 }
 0xc1e   : > { %5294 = vpow2.f32 %v3438_v26 }
 0xc20   : > { %v5291_v27 = vpop.eup %5290 }
 0xc21   : > { %v3431_v28 = vpop.xlane.xlu0 %3430  ;;  %v3444_v29 = vsel %vm1253_vm2, %v5291_v27, 0.0 }
 0xc22   : > { %v3435_v30 = vsub.f32 %v3416_v13, %v3431_v28  ;;  %3445 = vadd.xlane.f32.xlu1 %v3444_v29  ;;  %v4555_v28 = vld [vmem:[%s6256_s10 + $0x20] sm:$0xff]  ;;  %v4556_v29 = vld [vmem:[%s6256_s10 + $0x28] sm:$0xff] }
 0xc24   : > { %v5293_v31 = vpop.eup %5292  ;;  %v3442_v32 = vmul.f32 1.442695, %v3435_v30  ;;  %v5210_v30 = vpack.c.bf16 %v4556_v29, %v4555_v28  ;;  %v4578_v28 = vld [vmem:[%s6297_s20] ss:$0 sm:$0xff] }
 0xc25   : > { %v3450_v33 = vsel %vm1253_vm2, %v5293_v31, 0.0 }
 0xc26   : > { %5296 = vpow2.f32 %v3442_v32  ;;  %3451 = vadd.xlane.f32.xlu1 %v3450_v33  ;;  %v4562_v33 = vld [vmem:[%s6258_s12 + $0x40] sm:$0xff] }
 0xc28   : > { %v5295_v34 = vpop.eup %5294 }
 0xc29   : > { %v3447_v35 = vsel %vm1253_vm2, %v5295_v34, 0.0 }
 0xc2a   : > { %3448 = vadd.xlane.f32.xlu0 %v3447_v35  ;;  %v4564_v35 = vld [vmem:[%s6258_s12 + $0x50] sm:$0xff] }
 0xc30   : > { %v5297_v36 = vpop.eup %5296 }
 0xc31   : > { %v3453_v37 = vsel %vm1253_vm2, %v5297_v36, 0.0 }
 0xc32   : > { %3454 = vadd.xlane.f32.xlu0 %v3453_v37  ;;  %v4565_v37 = vld [vmem:[%s6258_s12 + $0x58] sm:$0xff] }
 0xcaf   : > { %v3446_v38 = vpop.xlane.xlu1 %3445 }
 0xcb0   : > { %5298 = vrcp.f32 %v3446_v38  ;;  %v5219_v38 = vpack.c.bf16 %v4565_v37, %v4564_v35 }
 0xcb3   : > { %v3452_v39 = vpop.xlane.xlu1 %3451 }
 0xcb4   : > { %5300 = vrcp.f32 %v3452_v39  ;;  %v4566_v39 = vld [vmem:[%s6258_s12 + $0x60] sm:$0xff] }
 0xcb7   : > { %v3449_v40 = vpop.xlane.xlu0 %3448 }
 0xcb8   : > { %5302 = vrcp.f32 %v3449_v40  ;;  %v4567_v40 = vld [vmem:[%s6258_s12 + $0x68] sm:$0xff] }
 0xcb9   : > { %v5222_v41 = vpack.c.bf16 %v4567_v40, %v4566_v39 }
 0xcba   : > { %v5299_v42 = vpop.eup %5298 }
 0xcbb   : > { %v3457_v43 = vmul.f32 %v5299_v42, %v5291_v27 }
 0xcbd   : > { %5028 = vmatmul.mubr.msk.f32.vlgmr.msra.gmra.mrb[36].mxu0 %vm1253_vm2, %v3457_v43 }
 0xcbe   : > { %v5301_v45 = vpop.eup %5300  ;;  %5036 = vmatpush3.msra.mxu0 %v3035_v44  ;;  %5037 = vmatprep.mubr.msk.f32.mxu0 %vm5377_vm0, %v5378_v9 }
 0xcbf   : > { %v3461_v46 = vmul.f32 %v5301_v45, %v5293_v31  ;;  %v3455_v48 = vpop.xlane.xlu0 %3454  ;;  %5045 = vmatprep.subr.mxu0 %v5378_v9  ;;  %v4558_v31 = vld [vmem:[%s6256_s10 + $0x38] sm:$0xff] }
 0xcc0   : > { %5304 = vrcp.f32 %v3455_v48 }
 0xcc1   : > { %5038 = vmatmul.mubr.msk.f32.vlgmr.msra.gmra.mrb[38].mxu0 %vm1253_vm2, %v3461_v46  ;;  %v4553_v46 = vld [vmem:[%s6254_s8 + $0x1] ss:$0 sm:$0xff] }
 0xcc2   : > { %v5303_v50 = vpop.eup %5302  ;;  %5047 = vmatprep.mubr.msk.f32.mxu0 %vm5377_vm0, %v5378_v9  ;;  %5046 = vmatpush3.msra.mxu0 %v4541_v55 }
 0xcc3   : > { %v3459_v47 = vmul.f32 %v5303_v50, %v5295_v34  ;;  %5055 = vmatprep.subr.mxu0 %v5378_v9  ;;  %v4563_v34 = vld [vmem:[%s6258_s12 + $0x48] sm:$0xff] }
 0xcc5   : > { %5033 = vmatmul.mubr.msk.f32.vlgmr.msra.gmra.mrb[32].mxu1 %vm1253_vm2, %v3459_v47 }
 0xcc6   : > { %5041 = vmatpush3.msra.mxu1 %v3105_v51  ;;  %5042 = vmatprep.mubr.msk.f32.mxu1 %vm5377_vm0, %v5378_v9  ;;  %v4569_v51 = vld [vmem:[%s6258_s12 + $0x78] sm:$0xff] }
 0xcc7   : > { %5050 = vmatprep.subr.mxu1 %v5378_v9 }
 0xcca   : > { %v5305_v52 = vpop.eup %5304 }
 0xccb   : > { %v3463_v54 = vmul.f32 %v5305_v52, %v5297_v36  ;;  %v5216_v36 = vpack.c.bf16 %v4563_v34, %v4562_v33 }
 0xccd   : > { %5043 = vmatmul.mubr.msk.f32.vlgmr.msra.gmra.mrb[34].mxu1 %vm1253_vm2, %v3463_v54  ;;  %v4560_v54 = vld [vmem:[%s6257_s11 + $0x1] ss:$0 sm:$0xff] }
 0xcce   : > { %5052 = vmatprep.mubr.msk.f32.mxu1 %vm5377_vm0, %v5378_v9  ;;  %5051 = vmatpush3.msra.mxu1 %v4542_v53 }
 0xccf   : > { %5060 = vmatprep.subr.mxu1 %v5378_v9 }
 0xd90   : > { %v3533_v56 = vpop.f32.mrb[36].mxu0 }
 0xd91   : > { %v5029_v57 = vpop.f32.mrb[37].mxu0  ;;  %5048 = vmatmul.mubr.msk.f32.vlgmr.msra.gmra.mrb[40].mxu0 %vm1253_vm2, %v3533_v56 }
 0xd92   : > { %5056 = vmatpush3.msra.mxu0 %v4543_v18  ;;  %5057 = vmatprep.mubr.msk.f32.mxu0 %vm5377_vm0, %v5378_v9  ;;  %v4571_v57 = vld [vmem:[%s6259_s13 + $0x1] ss:$0 sm:$0xff] }
 0xd93   : > { %5209 = vmatprep.subr.bf16.mxu0 %v5376_v3 }
 0xd94   : > { %v3679_v59 = vpop.f32.mrb[38].mxu0 }
 0xd95   : > { %v5039_v60 = vpop.f32.mrb[39].mxu0  ;;  %5058 = vmatmul.mubr.msk.f32.vlgmr.msra.gmra.mrb[42].mxu0 %vm1253_vm2, %v3679_v59 }
 0xd96   : > { %5073 = vmatprep.mubr.msk.f32.mxu0 %vm5377_vm0, %v5378_v9  ;;  %5211 = vmatpush3.bf16.msra.mxu0 %v5210_v30 }
 0xd97   : > { %5212 = vmatprep.subr.bf16.mxu0 %v5376_v3 }
 0xd98   : > { %v3606_v62 = vpop.f32.mrb[32].mxu1 }
 0xd99   : > { %v5034_v63 = vpop.f32.mrb[33].mxu1  ;;  %5053 = vmatmul.mubr.msk.f32.vlgmr.msra.gmra.mrb[36].mxu1 %vm1253_vm2, %v3606_v62 }
 0xd9a   : > { %5061 = vmatpush3.msra.mxu1 %v4544_v61  ;;  %5062 = vmatprep.mubr.msk.f32.mxu1 %vm5377_vm0, %v5378_v9 }
 0xd9b   : > { %5215 = vmatprep.subr.bf16.mxu1 %v5376_v3 }
 0xda0   : > { %v3752_v0 = vpop.f32.mrb[34].mxu1 }
 0xda1   : > { %v5044_v1 = vpop.f32.mrb[35].mxu1  ;;  %5063 = vmatmul.mubr.msk.f32.vlgmr.msra.gmra.mrb[38].mxu1 %vm1253_vm2, %v3752_v0 }
 0xda2   : > { %5092 = vmatprep.mubr.msk.f32.mxu1 %vm5377_vm0, %v5378_v9  ;;  %v4550_v9 = vld [vmem:[%s6253_s7 + $0x1] ss:$0 sm:$0xff]  ;;  %5217 = vmatpush3.bf16.msra.mxu1 %v5216_v36 }
 0xda3   : > { %5218 = vmatprep.subr.bf16.mxu1 %v5376_v3 }
 0xda6   : > { %5220 = vmatpush3.bf16.msra.mxu1 %v5219_v38 }
 0xda7   : > { %5221 = vmatprep.subr.bf16.mxu1 %v5376_v3 }
 0xdaa   : > { %5223 = vmatpush3.bf16.msra.mxu1 %v5222_v41 }
 0xdab   : > { %5224 = vmatprep.subr.bf16.mxu1 %v5376_v3  ;;  %v4568_v3 = vld [vmem:[%s6258_s12 + $0x70] sm:$0xff] }
 0xdac   : > { %v5225_v52 = vpack.c.bf16 %v4569_v51, %v4568_v3 }
 0xdae   : > { %5226 = vmatpush3.bf16.msra.mxu1 %v5225_v52 }
 0xe64   : > { %v3830_v2 = vpop.f32.mrb[40].mxu0 }
 0xe65   : > { %v5049_v19 = vpop.f32.mrb[41].mxu0  ;;  %v4053_v7 = vsel %vm635_vm1, %v3830_v2, 0.0 }
 0xe68   : > { %v3976_v4 = vpop.f32.mrb[42].mxu0 }
 0xe69   : > { %v5059_v5 = vpop.f32.mrb[43].mxu0  ;;  %v4056_v12 = vsel %vm635_vm1, %v3976_v4, 0.0 }
 0xe6c   : > { %v3903_v6 = vpop.f32.mrb[36].mxu1 }
 0xe6d   : > { %v4054_v8 = vsel %vm635_vm1, %v3903_v6, 0.0  ;;  %v5054_v10 = vpop.f32.mrb[37].mxu1 }
 0xe6e   : > { %v4055_v11 = vadd.f32 %v4054_v8, %v4053_v7  ;;  %v4575_v10 = vld [vmem:[%s6260_s14 + $0x1] ss:$0 sm:$0xff] }
 0xe70   : > { %v4057_v13 = vadd.f32 %v4056_v12, %v4055_v11  ;;  %v4576_v12 = vld [vmem:[%s6261_s15 + $0x1] ss:$0 sm:$0xff] }
 0xe74   : > { %v4049_v14 = vpop.f32.mrb[38].mxu1 }
 0xe75   : > { %v4058_v15 = vsel %vm635_vm1, %v4049_v14, 0.0  ;;  %v5064_v16 = vpop.f32.mrb[39].mxu1 }
 0xe76   : > { %v4059_v17 = vadd.f32 %v4058_v15, %v4057_v13 }
 0xe78   : > { %v4068_v20 = vadd.f32 %v4550_v9, %v4059_v17 }
 0xe7a   : > { %v4069_v21 = vadd.f32 %v4068_v20, %v5908_v58  ;;  %v4557_v58 = vld [vmem:[%s6256_s10 + $0x30] sm:$0xff] }
 0xe7b   : > { %v5213_v32 = vpack.c.bf16 %v4558_v31, %v4557_v58 }
 0xe7c   : > { %v4074_v22 = vsel %vm635_vm1, %v4069_v21, 0.0 }
 0xe7d   : > { %4075 = vadd.xlane.f32.xlu1 %v4074_v22  ;;  %5214 = vmatpush3.bf16.msra.mxu0 %v5213_v32 }
 0xf0a   : > { %v4076_v23 = vpop.xlane.xlu1 %4075 }
 0xf0b   : > { %v4077_v24 = vmul.f32 0.03125, %v4076_v23 }
 0xf0d   : > { %v4078_v25 = vsub.f32 %v4069_v21, %v4077_v24 }
 0xf0f   : > { %v4079_v26 = vmul.f32 %v4078_v25, %v4078_v25 }
 0xf11   : > { %v4080_v27 = vsel %vm635_vm1, %v4079_v26, 0.0  ;;  %v4577_v26 = vld [vmem:[%s6296_s27] ss:$0 sm:$0xff]  ;;  %s5318_s27 = scalar_lea.vmem %s5317_s19, 256 }
 0xf12   : > { %4081 = vadd.xlane.f32.xlu0 %v4080_v27  ;;  %p5320_p1 = scmp.lt.s32.totalorder %s5318_s27, %s5312_s16 }
 0xf14   : > { %p5321_p2 = por %p5320_p1, %p5319_p0 }
 0xf16   : > { %p5322_p3 = pnand %p5321_p2, %p5315_p13 }
 0xf9f   : > { %v4082_v42 = vpop.xlane.xlu0 %4081 }
 0xfa0   : > { %v4083_v43 = vmul.f32 0.03125, %v4082_v42 }
 0xfa2   : > { %v4084_v44 = vadd.f32 1e-05, %v4083_v43 }
 0xfa4   : > { %5306 = vrsqrt.f32 %v4084_v44 }
 0xfae   : > { %v5307_v45 = vpop.eup %5306 }
 0xfaf   : > { %v4086_v48 = vmul.f32 %v5307_v45, %v4078_v25 }
 0xfb1   : > { %v4093_v50 = vmul.f32 %v4553_v46, %v4086_v48 }
 0xfb3   : > { %v4100_v47 = vadd.f32 %v4554_v49, %v4093_v50 }
 0xfb5   : > { %5074 = vmatmul.mubr.msk.f32.vlgmr.msra.gmra.mrb[44].mxu0 %vm635_vm1, %v4100_v47 }
0x1088   : > { %v4183_v55 = vpop.f32.mrb[44].mxu0 }
0x1089   : > { %v4184_v53 = vadd.f32 %v4560_v54, %v4183_v55  ;;  %v5075_v18 = vpop.f32.mrb[45].mxu0 }
0x108b   : > { %v4187_v56 = vmax.f32 %v4184_v53, 0.0 }
0x108d   : > { %5093 = vmatmul.mubr.msk.f32.vlgmr.msra.gmra.mrb[40].mxu1 %vm2341_vm3, %v4187_v56 }
0x1160   : > { %v4274_v59 = vpop.f32.mrb[40].mxu1 }
0x1161   : > { %v4275_v60 = vadd.f32 %v4571_v57, %v4274_v59  ;;  %v5094_v61 = vpop.f32.mrb[41].mxu1 }
0x1163   : > { %v4278_v62 = vadd.f32 %v4275_v60, %v4100_v47 }
0x1165   : > { %v4283_v63 = vsel %vm635_vm1, %v4278_v62, 0.0 }
0x1166   : > { %4284 = vadd.xlane.f32.xlu1 %v4283_v63 }
0x11f3   : > { %v4285_v0 = vpop.xlane.xlu1 %4284 }
0x11f4   : > { %v4286_v1 = vmul.f32 0.03125, %v4285_v0 }
0x11f6   : > { %v4287_v2 = vsub.f32 %v4278_v62, %v4286_v1 }
0x11f8   : > { %v4288_v19 = vmul.f32 %v4287_v2, %v4287_v2 }
0x11fa   : > { %v4289_v4 = vsel %vm635_vm1, %v4288_v19, 0.0 }
0x11fb   : > { %4290 = vadd.xlane.f32.xlu0 %v4289_v4 }
0x1288   : > { %v4291_v5 = vpop.xlane.xlu0 %4290 }
0x1289   : > { %v4292_v6 = vmul.f32 0.03125, %v4291_v5 }
0x128b   : > { %v4293_v7 = vadd.f32 1e-05, %v4292_v6 }
0x128d   : > { %5308 = vrsqrt.f32 %v4293_v7 }
0x1297   : > { %v5309_v8 = vpop.eup %5308 }
0x1298   : > { %v4295_v11 = vmul.f32 %v5309_v8, %v4287_v2 }
0x129a   : > { %v4302_v13 = vmul.f32 %v4575_v10, %v4295_v11 }
0x129c   : > { %v4309_v14 = vadd.f32 %v4576_v12, %v4302_v13 }
0x129e   : > { %v4312_v15 = vsel %vm635_vm1, %v4309_v14, 0.0 }
0x129f   : > { %4313 = vadd.xlane.f32.xlu1 %v4312_v15 }
0x132c   : > { %v4314_v9 = vpop.xlane.xlu1 %4313 }
0x132d   : > { %v4315_v16 = vmul.f32 0.03125, %v4314_v9 }
0x132f   : > { %v4316_v17 = vsub.f32 %v4309_v14, %v4315_v16 }
0x1331   : > { %v4317_v20 = vmul.f32 %v4316_v17, %v4316_v17 }
0x1333   : > { %v4318_v21 = vsel %vm635_vm1, %v4317_v20, 0.0 }
0x1334   : > { %4319 = vadd.xlane.f32.xlu0 %v4318_v21 }
0x13c1   : > { %v4320_v22 = vpop.xlane.xlu0 %4319 }
0x13c2   : > { %v4321_v23 = vmul.f32 0.03125, %v4320_v22 }
0x13c4   : > { %v4322_v24 = vadd.f32 1e-05, %v4321_v23 }
0x13c6   : > { %5310 = vrsqrt.f32 %v4322_v24 }
0x13d0   : > { %v5311_v25 = vpop.eup %5310 }
0x13d1   : > { %v4324_v27 = vmul.f32 %v5311_v25, %v4316_v17 }
0x13d3   : > { %v4331_v29 = vmul.f32 %v4577_v26, %v4324_v27 }
0x13d5   : > { %v4338_v30 = vadd.f32 %v4578_v28, %v4331_v29 }
0x13d7   : > { %4339 = vst.msk [vmem:[%s579_s24] sm:$0xff] %vm635_vm1, %v4338_v30 }
0x13d8   : > { %5325 = shalt.err (!%p5322_p3)
}
0x13d9   : > { %s5326_s25 = scalar_lea.hbm %s6203_s3, 128  ;;  %s5330_s20 = scalar_lea.hbm %s6298_s1, 256 }
0x13da   : > { %p5327_p4 = scmp.ne.s32.totalorder %s6203_s3, %s5326_s25  ;;  %p5331_p9 = scmp.lt.u32.totalorder %s6203_s3, %s6298_s1 }
0x13db   : > { %p5332_p10 = scmp.lt.u32.totalorder %s5330_s20, %s5326_s25  ;;  %p5334_p12 = scmp.lt.u32.totalorder %s5326_s25, %s6203_s3 }
0x13dc   : > { %p5328_p7 = pnand %p5327_p4, %p5514_p5 }
0x13dd   : > { %p5333_p11 = por %p5332_p10, %p5331_p9 }
0x13de   : > { %p5329_p8 = pneg %p5328_p7 }
0x13df   : > { %p5335_p13 = por %p5334_p12, %p5333_p11 }
0x13e1   : > { %p5336_p0 = pnand %p5335_p13, %p5329_p8 }
0x13e3   : > { %5339 = shalt.err (!%p5336_p0)
}
0x13e4   : > { %5227 = dma.vmem_to_hbm [thread:$0]  (%p5514_p5), %s6205_s22, 128, %s6203_s3, %s4341_s17  }
0x13e5 PF: > { %s6299_s21 = sld [smem:[#allocation7_spill]]  ;;  %s6300_s29 = sld [smem:[#allocation5_spill]] }
0x13eb   : > { %p5233_p1 = scmp.ge.s32.totalorder %s6299_s21, 2  ;;  %s4366_s0 = sand.u32 1, %s6300_s29  }
0x13ec   : > { %s4367_s19 = scalar_lea.sflag [#allocation3], %s4366_s0 }
0x13ed   : > { %p5230_p2 = pnand %p5233_p1, %p5518_p6 }
0x13ef   : > { %5357 = dma.done.wait (!%p5230_p2), %s4367_s19, 128  }
0x13f0   : > { %5359 = vsyncadd (!%p5230_p2), %s4367_s19, 4294967168  ;;  %s6302_s30 = sld [smem:[#allocation8_spill]]  ;;  %s6303_s25 = sld [smem:[#allocation6_spill]] }
0x13f1   : > { %s6304_s29 = sld [smem:[#allocation9_spill]]  ;;  %s6305_s27 = smov %s5366_s28 }
0x13f6   : > { %p28_p3 = scmp.ge.s32.totalorder %s6302_s30, 4   ;;  %s6306_s28 = smov %s6303_s25 }
0x13f8   :  { %30 = sbr.rel (!%p28_p3) target bundleno = 11 (0xb), region = 144 }
0x13ff   :  { %4372 = vsyncpa [#allocation3], 1 }
0x1400   :  { %4374 = vsyncpa [#allocation3 + $0x1], 1 }

</bundles_post_ra>
